<compile_context>
chip_gen: v5e
topology: v5e:2x2
jax: 0.10.0
libtpu: 0.0.40
codegen_flags: <defaults>
</compile_context>

<pallas_src>
import numpy as np
import jax
import jax.numpy as jnp
from jax import lax
from jax.experimental import pallas as pl
from jax.experimental.pallas import tpu as pltpu


def _vmem_spec():
    return pl.BlockSpec(memory_space=pltpu.MemorySpace.VMEM)


# ------------------------------ fused kernel ------------------------------- #

def net_fused_kernel(a_ref, w1_ref, wb_ref, sp_ref, o_ref):
    # a_ref : [4, B*16, 128] bf16  conv1 patch rows, pre-split by input-row parity:
    #         0: h'=0,2,..,30  1: h'=2,4,..,32  2: h'=1,3,..,31  3: h'=3,5,..,33
    #         lanes = (w' 0..33, cin 0..2), zero pad, lane 127 == 1.0 (bias carrier)
    # w1_ref: [3, 128, 512] bf16   conv1 structured weights per kh; columns are
    #         (w-parity, w2, cout); conv1 bias folded into row 127 of kh==1
    # wb_ref: [1280, 128] bf16     rows 0..767: conv2 structured weights (3x[256,128])
    #                              rows 768..1279: fc1 weights (permuted, cols padded)
    # sp_ref: [136, 128] f32       row0: conv2 bias (tiled), row1: fc1 bias (padded),
    #                              row2[:2]: fc2 bias, rows 8..39[:2]: fc2 weights
    # o_ref : [B, 2] f32
    f32 = jnp.float32
    bf16 = jnp.bfloat16
    B = o_ref.shape[0]

    def mm(a, b):
        return jnp.dot(a, b, preferred_element_type=f32)

    # ---- conv1 (+bias +relu): 6 lane-dense MXU matmuls -> [B*16, 512] ----
    ae0, ae1, ao0, ao1 = a_ref[0], a_ref[1], a_ref[2], a_ref[3]
    w10, w11, w12 = w1_ref[0], w1_ref[1], w1_ref[2]
    z1e = jnp.maximum(mm(ae0, w10) + mm(ao0, w11) + mm(ae1, w12), 0.0)  # even rows
    z1o = jnp.maximum(mm(ao0, w10) + mm(ae1, w11) + mm(ao1, w12), 0.0)  # odd rows

    # ---- maxpool1 2x2: h-pairs = the two arrays, w-pairs = the lane halves ----
    hmax = jnp.maximum(z1e, z1o)                                   # [B*16, 512]
    p1 = jnp.maximum(hmax[:, :256], hmax[:, 256:]).astype(bf16)    # [B*16, 256]

    # ---- conv2: 3 matmuls over the (w2, cin) lanes; h taps via row shifts ----
    o0 = mm(p1, wb_ref[0:256, :]).reshape(B, 16, 128)
    o1 = mm(p1, wb_ref[256:512, :]).reshape(B, 16, 128)
    o2 = mm(p1, wb_ref[512:768, :]).reshape(B, 16, 128)
    zrow = jnp.zeros((B, 1, 128), f32)
    c2 = (o1
          + jnp.concatenate([zrow, o0[:, :15, :]], axis=1)
          + jnp.concatenate([o2[:, 1:, :], zrow], axis=1))
    c2 = jnp.maximum(c2 + sp_ref[0:1, :], 0.0)                     # bias + relu

    # ---- maxpool2 2x2 + flatten to (h, w, c) order (tiny, unrolled) ----
    chunks = []
    for m in range(8):
        r = jnp.maximum(c2[:, 2 * m, :], c2[:, 2 * m + 1, :])      # [B, 128]
        chunks.append(jnp.maximum(r[:, :64], r[:, 64:]))           # [B, 64]
    flat = jnp.concatenate(chunks, axis=1).astype(bf16)            # [B, 512]

    # ---- fc1 (+bias, tanh, output padded to 128 lanes) -> fc2 ----
    h = jnp.tanh(mm(flat, wb_ref[768:1280, :]) + sp_ref[1:2, :])   # [B, 128]
    out = jnp.dot(h, sp_ref[8:136, 0:2],
                  preferred_element_type=f32) + sp_ref[2:3, 0:2]   # [B, 2]
    o_ref[...] = out


# ------------------------------- wrappers ---------------------------------- #

def net_forward_pallas(x_nchw, prep):
    B = x_nchw.shape[0]
    # One-time XLA-side relayout: NCHW -> padded NHWC with (w, cin) merged on
    # lanes, a bias-carrier lane, rows pre-split by the parity needed by the
    # first 2x2 pool.  Everything else runs inside the single fused kernel.
    x = jnp.transpose(x_nchw, (0, 2, 3, 1))                        # [B,32,32,3]
    x = jnp.pad(x, ((0, 0), (1, 1), (1, 1), (0, 0)))               # [B,34,34,3]
    a = x.reshape(B, 34, 102)
    a = jnp.pad(a, ((0, 0), (0, 0), (0, 26)))                      # [B,34,128]
    a = a.at[:, :, 127].set(1.0)                                   # bias carrier

    def rows(lo):
        return a[:, lo::2, :][:, :16, :].reshape(B * 16, 128)

    a_in = jnp.stack([rows(0), rows(2), rows(1), rows(3)], axis=0)
    a_in = a_in.astype(jnp.bfloat16)                               # [4,B*16,128]

    return pl.pallas_call(
        net_fused_kernel,
        out_shape=jax.ShapeDtypeStruct((B, 2), jnp.float32),
        in_specs=[_vmem_spec()] * 4,
        out_specs=_vmem_spec(),
    )(a_in, prep["w1s"], prep["wbig"], prep["smallp"])


net_forward = jax.jit(net_forward_pallas)


def init_params(key):
    ks = jax.random.split(key, 8)
    return {
        # conv1: (kh, kw, cin, cout)  (torch layout would be (16, 3, 3, 3))
        "w1c": jax.random.normal(ks[0], (3, 3, 3, 16), jnp.float32) * 0.1,
        "b1c": jax.random.normal(ks[1], (16,), jnp.float32) * 0.1,
        "w2c": jax.random.normal(ks[2], (3, 3, 16, 8), jnp.float32) * 0.1,
        "b2c": jax.random.normal(ks[3], (8,), jnp.float32) * 0.1,
        # fc1: (in, out) with in-index in torch (c, h, w) flatten order
        "w1f": jax.random.normal(ks[4], (512, 32), jnp.float32) * 0.05,
        "b1f": jax.random.normal(ks[5], (32,), jnp.float32) * 0.05,
        "w2f": jax.random.normal(ks[6], (32, 2), jnp.float32) * 0.05,
        "b2f": jax.random.normal(ks[7], (2,), jnp.float32) * 0.05,
    }


def prepare_params(p):
    """One-time host-side construction of the packed / structured weights."""
    w1 = np.asarray(p["w1c"], np.float32)   # [3,3,3,16]  (kh, kw, cin, cout)
    b1 = np.asarray(p["b1c"], np.float32)
    w2 = np.asarray(p["w2c"], np.float32)   # [3,3,16,8]
    b2 = np.asarray(p["b2c"], np.float32)
    wf1 = np.asarray(p["w1f"], np.float32)  # [512,32], rows in (c,h,w) order
    bf1 = np.asarray(p["b1f"], np.float32)
    wf2 = np.asarray(p["w2f"], np.float32)  # [32,2]
    bf2 = np.asarray(p["b2f"], np.float32)

    # conv1 structured weights: rows = (w' 0..33, cin), cols = (w-parity, w2, cout)
    w1s = np.zeros((3, 128, 512), np.float32)
    for kh in range(3):
        for wp in range(34):
            for kw in range(3):
                wo = wp - kw
                if 0 <= wo <= 31:
                    w2o, par = divmod(wo, 2)
                    col = par * 256 + w2o * 16
                    w1s[kh, wp * 3:wp * 3 + 3, col:col + 16] = w1[kh, kw]
    w1s[1, 127, :] = np.tile(b1, 32)        # bias via the 1.0 carrier lane

    # conv2 structured weights: rows = (w2_in, cin), cols = (w-parity, w2_out, cout)
    w2s = np.zeros((3, 256, 128), np.float32)
    for kh in range(3):
        for wi in range(16):
            for kw in range(3):
                wo = wi + 1 - kw
                if 0 <= wo <= 15:
                    w2o, par = divmod(wo, 2)
                    col = par * 64 + w2o * 8
                    w2s[kh, wi * 16:wi * 16 + 16, col:col + 8] = w2[kh, kw]

    # fc1: permute rows from torch (c,h,w) flatten to kernel (h,w,c), pad cols
    wf1p = wf1.reshape(8, 8, 8, 32).transpose(1, 2, 0, 3).reshape(512, 32)
    wf1pad = np.zeros((512, 128), np.float32)
    wf1pad[:, :32] = wf1p

    wbig = np.concatenate([w2s.reshape(768, 128), wf1pad], axis=0)  # [1280,128]

    smallp = np.zeros((136, 128), np.float32)
    smallp[0, :] = np.tile(b2, 16)          # conv2 bias tiled over (parity, w2)
    smallp[1, :32] = bf1                    # fc1 bias (padded lanes stay 0)
    smallp[2, :2] = bf2                     # fc2 bias
    smallp[8:40, :2] = wf2                  # fc2 weights (rows 32..127 zero)

    return {
        "w1s": jnp.asarray(w1s, jnp.bfloat16),
        "wbig": jnp.asarray(wbig, jnp.bfloat16),
        "smallp": jnp.asarray(smallp, jnp.float32),
    }


def net_reference(x_nchw, p):
    """Pure-JAX reference in torch layout (numerical sanity check)."""
    hi = lax.Precision.HIGHEST
    w1 = jnp.transpose(p["w1c"], (3, 2, 0, 1))     # -> OIHW
    y = lax.conv_general_dilated(x_nchw, w1, (1, 1), ((1, 1), (1, 1)),
                                 dimension_numbers=("NCHW", "OIHW", "NCHW"),
                                 precision=hi)
    y = jnp.maximum(y + p["b1c"][None, :, None, None], 0.0)
    y = lax.reduce_window(y, -jnp.inf, lax.max, (1, 1, 2, 2), (1, 1, 2, 2), "VALID")
    w2 = jnp.transpose(p["w2c"], (3, 2, 0, 1))
    y = lax.conv_general_dilated(y, w2, (1, 1), ((1, 1), (1, 1)),
                                 dimension_numbers=("NCHW", "OIHW", "NCHW"),
                                 precision=hi)
    y = jnp.maximum(y + p["b2c"][None, :, None, None], 0.0)
    y = lax.reduce_window(y, -jnp.inf, lax.max, (1, 1, 2, 2), (1, 1, 2, 2), "VALID")
    y = y.reshape(y.shape[0], -1)                  # NCHW flatten == torch order
    y = jnp.tanh(jnp.dot(y, p["w1f"], precision=hi) + p["b1f"])
    return jnp.dot(y, p["w2f"], precision=hi) + p["b2f"]


if __name__ == "__main__":
    key = jax.random.PRNGKey(0)
    k_in, k_par = jax.random.split(key)
    # Spatial size 32 is fixed by the module (8*8*8 flatten after two pools).
    x = jax.random.normal(k_in, (2, 3, 32, 32), jnp.float32)
    params = init_params(k_par)
    prep = prepare_params(params)

    out = jax.block_until_ready(net_forward(x, prep))
    assert out.shape == (2, 2) and out.dtype == jnp.float32

    ref = jax.block_until_ready(net_reference(x, params))
    max_diff = float(jnp.max(jnp.abs(out - ref)))
    assert jnp.allclose(out, ref, atol=5e-2, rtol=5e-2), f"mismatch: {max_diff}"

    print("KERNEL_OK")
</pallas_src>

<mosaic_0001>
module attributes {stable_mosaic.version = 11 : i64} {
  func.func @net_fused_kernel(%arg0: memref<4x32x128xbf16, #tpu.memory_space<vmem>>, %arg1: memref<3x128x512xbf16, #tpu.memory_space<vmem>>, %arg2: memref<1280x128xbf16, #tpu.memory_space<vmem>>, %arg3: memref<136x128xf32, #tpu.memory_space<vmem>>, %arg4: memref<2x2xf32, #tpu.memory_space<vmem>>) attributes {dimension_semantics = [], scalar_prefetch = 0 : i64, scratch_operands = 0 : i64, tpu.core_type = #tpu.core_type<tc>} {
    %c0 = arith.constant 0 : index
    %c0_0 = arith.constant 0 : index
    %c0_1 = arith.constant 0 : index
    %0 = vector.load %arg0[%c0, %c0_0, %c0_1] : memref<4x32x128xbf16, #tpu.memory_space<vmem>>, vector<1x32x128xbf16>
    %1 = vector.shape_cast %0 : vector<1x32x128xbf16> to vector<32x128xbf16>
    %c1 = arith.constant 1 : index
    %c0_2 = arith.constant 0 : index
    %c0_3 = arith.constant 0 : index
    %2 = vector.load %arg0[%c1, %c0_2, %c0_3] : memref<4x32x128xbf16, #tpu.memory_space<vmem>>, vector<1x32x128xbf16>
    %3 = vector.shape_cast %2 : vector<1x32x128xbf16> to vector<32x128xbf16>
    %c2 = arith.constant 2 : index
    %c0_4 = arith.constant 0 : index
    %c0_5 = arith.constant 0 : index
    %4 = vector.load %arg0[%c2, %c0_4, %c0_5] : memref<4x32x128xbf16, #tpu.memory_space<vmem>>, vector<1x32x128xbf16>
    %5 = vector.shape_cast %4 : vector<1x32x128xbf16> to vector<32x128xbf16>
    %c3 = arith.constant 3 : index
    %c0_6 = arith.constant 0 : index
    %c0_7 = arith.constant 0 : index
    %6 = vector.load %arg0[%c3, %c0_6, %c0_7] : memref<4x32x128xbf16, #tpu.memory_space<vmem>>, vector<1x32x128xbf16>
    %7 = vector.shape_cast %6 : vector<1x32x128xbf16> to vector<32x128xbf16>
    %c0_8 = arith.constant 0 : index
    %c0_9 = arith.constant 0 : index
    %c0_10 = arith.constant 0 : index
    %8 = vector.load %arg1[%c0_8, %c0_9, %c0_10] : memref<3x128x512xbf16, #tpu.memory_space<vmem>>, vector<1x128x512xbf16>
    %9 = vector.shape_cast %8 : vector<1x128x512xbf16> to vector<128x512xbf16>
    %c1_11 = arith.constant 1 : index
    %c0_12 = arith.constant 0 : index
    %c0_13 = arith.constant 0 : index
    %10 = vector.load %arg1[%c1_11, %c0_12, %c0_13] : memref<3x128x512xbf16, #tpu.memory_space<vmem>>, vector<1x128x512xbf16>
    %11 = vector.shape_cast %10 : vector<1x128x512xbf16> to vector<128x512xbf16>
    %c2_14 = arith.constant 2 : index
    %c0_15 = arith.constant 0 : index
    %c0_16 = arith.constant 0 : index
    %12 = vector.load %arg1[%c2_14, %c0_15, %c0_16] : memref<3x128x512xbf16, #tpu.memory_space<vmem>>, vector<1x128x512xbf16>
    %13 = vector.shape_cast %12 : vector<1x128x512xbf16> to vector<128x512xbf16>
    %cst = arith.constant dense<0.000000e+00> : vector<32x512xf32>
    %14 = tpu.matmul %1, %9, %cst {dimension_numbers = #tpu.dot_dimension_numbers<[1], [0], [0], [1], [0, 0, 1, 1], [], []>} : vector<32x128xbf16>, vector<128x512xbf16>, vector<32x512xf32> -> vector<32x512xf32>
    %cst_17 = arith.constant dense<0.000000e+00> : vector<32x512xf32>
    %15 = tpu.matmul %5, %11, %cst_17 {dimension_numbers = #tpu.dot_dimension_numbers<[1], [0], [0], [1], [0, 0, 1, 1], [], []>} : vector<32x128xbf16>, vector<128x512xbf16>, vector<32x512xf32> -> vector<32x512xf32>
    %16 = arith.addf %14, %15 : vector<32x512xf32>
    %cst_18 = arith.constant dense<0.000000e+00> : vector<32x512xf32>
    %17 = tpu.matmul %3, %13, %cst_18 {dimension_numbers = #tpu.dot_dimension_numbers<[1], [0], [0], [1], [0, 0, 1, 1], [], []>} : vector<32x128xbf16>, vector<128x512xbf16>, vector<32x512xf32> -> vector<32x512xf32>
    %18 = arith.addf %16, %17 : vector<32x512xf32>
    %cst_19 = arith.constant 0.000000e+00 : f32
    %19 = vector.broadcast %cst_19 : f32 to vector<32x512xf32>
    %20 = arith.maximumf %18, %19 : vector<32x512xf32>
    %cst_20 = arith.constant dense<0.000000e+00> : vector<32x512xf32>
    %21 = tpu.matmul %5, %9, %cst_20 {dimension_numbers = #tpu.dot_dimension_numbers<[1], [0], [0], [1], [0, 0, 1, 1], [], []>} : vector<32x128xbf16>, vector<128x512xbf16>, vector<32x512xf32> -> vector<32x512xf32>
    %cst_21 = arith.constant dense<0.000000e+00> : vector<32x512xf32>
    %22 = tpu.matmul %3, %11, %cst_21 {dimension_numbers = #tpu.dot_dimension_numbers<[1], [0], [0], [1], [0, 0, 1, 1], [], []>} : vector<32x128xbf16>, vector<128x512xbf16>, vector<32x512xf32> -> vector<32x512xf32>
    %23 = arith.addf %21, %22 : vector<32x512xf32>
    %cst_22 = arith.constant dense<0.000000e+00> : vector<32x512xf32>
    %24 = tpu.matmul %7, %13, %cst_22 {dimension_numbers = #tpu.dot_dimension_numbers<[1], [0], [0], [1], [0, 0, 1, 1], [], []>} : vector<32x128xbf16>, vector<128x512xbf16>, vector<32x512xf32> -> vector<32x512xf32>
    %25 = arith.addf %23, %24 : vector<32x512xf32>
    %cst_23 = arith.constant 0.000000e+00 : f32
    %26 = vector.broadcast %cst_23 : f32 to vector<32x512xf32>
    %27 = arith.maximumf %25, %26 : vector<32x512xf32>
    %28 = arith.maximumf %20, %27 : vector<32x512xf32>
    %29 = vector.extract_strided_slice %28 {offsets = [0, 0], sizes = [32, 256], strides = [1, 1]} : vector<32x512xf32> to vector<32x256xf32>
    %30 = vector.extract_strided_slice %28 {offsets = [0, 256], sizes = [32, 256], strides = [1, 1]} : vector<32x512xf32> to vector<32x256xf32>
    %31 = arith.maximumf %29, %30 : vector<32x256xf32>
    %32 = arith.truncf %31 : vector<32x256xf32> to vector<32x256xbf16>
    %c0_24 = arith.constant 0 : index
    %c0_25 = arith.constant 0 : index
    %33 = vector.load %arg2[%c0_24, %c0_25] : memref<1280x128xbf16, #tpu.memory_space<vmem>>, vector<256x128xbf16>
    %cst_26 = arith.constant dense<0.000000e+00> : vector<32x128xf32>
    %34 = tpu.matmul %32, %33, %cst_26 {dimension_numbers = #tpu.dot_dimension_numbers<[1], [0], [0], [1], [0, 0, 1, 1], [], []>} : vector<32x256xbf16>, vector<256x128xbf16>, vector<32x128xf32> -> vector<32x128xf32>
    %35 = vector.shape_cast %34 : vector<32x128xf32> to vector<2x16x128xf32>
    %c256 = arith.constant 256 : index
    %c0_27 = arith.constant 0 : index
    %36 = vector.load %arg2[%c256, %c0_27] : memref<1280x128xbf16, #tpu.memory_space<vmem>>, vector<256x128xbf16>
    %cst_28 = arith.constant dense<0.000000e+00> : vector<32x128xf32>
    %37 = tpu.matmul %32, %36, %cst_28 {dimension_numbers = #tpu.dot_dimension_numbers<[1], [0], [0], [1], [0, 0, 1, 1], [], []>} : vector<32x256xbf16>, vector<256x128xbf16>, vector<32x128xf32> -> vector<32x128xf32>
    %38 = vector.shape_cast %37 : vector<32x128xf32> to vector<2x16x128xf32>
    %c512 = arith.constant 512 : index
    %c0_29 = arith.constant 0 : index
    %39 = vector.load %arg2[%c512, %c0_29] : memref<1280x128xbf16, #tpu.memory_space<vmem>>, vector<256x128xbf16>
    %cst_30 = arith.constant dense<0.000000e+00> : vector<32x128xf32>
    %40 = tpu.matmul %32, %39, %cst_30 {dimension_numbers = #tpu.dot_dimension_numbers<[1], [0], [0], [1], [0, 0, 1, 1], [], []>} : vector<32x256xbf16>, vector<256x128xbf16>, vector<32x128xf32> -> vector<32x128xf32>
    %41 = vector.shape_cast %40 : vector<32x128xf32> to vector<2x16x128xf32>
    %cst_31 = arith.constant 0.000000e+00 : f32
    %42 = vector.broadcast %cst_31 : f32 to vector<2x1x128xf32>
    %43 = vector.extract_strided_slice %35 {offsets = [0, 0, 0], sizes = [2, 15, 128], strides = [1, 1, 1]} : vector<2x16x128xf32> to vector<2x15x128xf32>
    %44 = tpu.concatenate %42, %43 in 1 : vector<2x1x128xf32>, vector<2x15x128xf32> -> vector<2x16x128xf32>
    %45 = arith.addf %38, %44 : vector<2x16x128xf32>
    %46 = vector.extract_strided_slice %41 {offsets = [0, 1, 0], sizes = [2, 15, 128], strides = [1, 1, 1]} : vector<2x16x128xf32> to vector<2x15x128xf32>
    %47 = tpu.concatenate %46, %42 in 1 : vector<2x15x128xf32>, vector<2x1x128xf32> -> vector<2x16x128xf32>
    %48 = arith.addf %45, %47 : vector<2x16x128xf32>
    %c0_32 = arith.constant 0 : index
    %c0_33 = arith.constant 0 : index
    %49 = vector.load %arg3[%c0_32, %c0_33] : memref<136x128xf32, #tpu.memory_space<vmem>>, vector<1x128xf32>
    %50 = vector.shape_cast %49 : vector<1x128xf32> to vector<1x1x128xf32>
    %51 = vector.broadcast %50 : vector<1x1x128xf32> to vector<2x16x128xf32>
    %52 = arith.addf %48, %51 : vector<2x16x128xf32>
    %cst_34 = arith.constant 0.000000e+00 : f32
    %53 = vector.broadcast %cst_34 : f32 to vector<2x16x128xf32>
    %54 = arith.maximumf %52, %53 : vector<2x16x128xf32>
    %55 = vector.extract_strided_slice %54 {offsets = [0, 0, 0], sizes = [2, 1, 128], strides = [1, 1, 1]} : vector<2x16x128xf32> to vector<2x1x128xf32>
    %56 = vector.shape_cast %55 : vector<2x1x128xf32> to vector<2x128xf32>
    %57 = vector.extract_strided_slice %54 {offsets = [0, 1, 0], sizes = [2, 1, 128], strides = [1, 1, 1]} : vector<2x16x128xf32> to vector<2x1x128xf32>
    %58 = vector.shape_cast %57 : vector<2x1x128xf32> to vector<2x128xf32>
    %59 = arith.maximumf %56, %58 : vector<2x128xf32>
    %60 = vector.extract_strided_slice %59 {offsets = [0, 0], sizes = [2, 64], strides = [1, 1]} : vector<2x128xf32> to vector<2x64xf32>
    %61 = vector.extract_strided_slice %59 {offsets = [0, 64], sizes = [2, 64], strides = [1, 1]} : vector<2x128xf32> to vector<2x64xf32>
    %62 = arith.maximumf %60, %61 : vector<2x64xf32>
    %63 = vector.extract_strided_slice %54 {offsets = [0, 2, 0], sizes = [2, 1, 128], strides = [1, 1, 1]} : vector<2x16x128xf32> to vector<2x1x128xf32>
    %64 = vector.shape_cast %63 : vector<2x1x128xf32> to vector<2x128xf32>
    %65 = vector.extract_strided_slice %54 {offsets = [0, 3, 0], sizes = [2, 1, 128], strides = [1, 1, 1]} : vector<2x16x128xf32> to vector<2x1x128xf32>
    %66 = vector.shape_cast %65 : vector<2x1x128xf32> to vector<2x128xf32>
    %67 = arith.maximumf %64, %66 : vector<2x128xf32>
    %68 = vector.extract_strided_slice %67 {offsets = [0, 0], sizes = [2, 64], strides = [1, 1]} : vector<2x128xf32> to vector<2x64xf32>
    %69 = vector.extract_strided_slice %67 {offsets = [0, 64], sizes = [2, 64], strides = [1, 1]} : vector<2x128xf32> to vector<2x64xf32>
    %70 = arith.maximumf %68, %69 : vector<2x64xf32>
    %71 = vector.extract_strided_slice %54 {offsets = [0, 4, 0], sizes = [2, 1, 128], strides = [1, 1, 1]} : vector<2x16x128xf32> to vector<2x1x128xf32>
    %72 = vector.shape_cast %71 : vector<2x1x128xf32> to vector<2x128xf32>
    %73 = vector.extract_strided_slice %54 {offsets = [0, 5, 0], sizes = [2, 1, 128], strides = [1, 1, 1]} : vector<2x16x128xf32> to vector<2x1x128xf32>
    %74 = vector.shape_cast %73 : vector<2x1x128xf32> to vector<2x128xf32>
    %75 = arith.maximumf %72, %74 : vector<2x128xf32>
    %76 = vector.extract_strided_slice %75 {offsets = [0, 0], sizes = [2, 64], strides = [1, 1]} : vector<2x128xf32> to vector<2x64xf32>
    %77 = vector.extract_strided_slice %75 {offsets = [0, 64], sizes = [2, 64], strides = [1, 1]} : vector<2x128xf32> to vector<2x64xf32>
    %78 = arith.maximumf %76, %77 : vector<2x64xf32>
    %79 = vector.extract_strided_slice %54 {offsets = [0, 6, 0], sizes = [2, 1, 128], strides = [1, 1, 1]} : vector<2x16x128xf32> to vector<2x1x128xf32>
    %80 = vector.shape_cast %79 : vector<2x1x128xf32> to vector<2x128xf32>
    %81 = vector.extract_strided_slice %54 {offsets = [0, 7, 0], sizes = [2, 1, 128], strides = [1, 1, 1]} : vector<2x16x128xf32> to vector<2x1x128xf32>
    %82 = vector.shape_cast %81 : vector<2x1x128xf32> to vector<2x128xf32>
    %83 = arith.maximumf %80, %82 : vector<2x128xf32>
    %84 = vector.extract_strided_slice %83 {offsets = [0, 0], sizes = [2, 64], strides = [1, 1]} : vector<2x128xf32> to vector<2x64xf32>
    %85 = vector.extract_strided_slice %83 {offsets = [0, 64], sizes = [2, 64], strides = [1, 1]} : vector<2x128xf32> to vector<2x64xf32>
    %86 = arith.maximumf %84, %85 : vector<2x64xf32>
    %87 = vector.extract_strided_slice %54 {offsets = [0, 8, 0], sizes = [2, 1, 128], strides = [1, 1, 1]} : vector<2x16x128xf32> to vector<2x1x128xf32>
    %88 = vector.shape_cast %87 : vector<2x1x128xf32> to vector<2x128xf32>
    %89 = vector.extract_strided_slice %54 {offsets = [0, 9, 0], sizes = [2, 1, 128], strides = [1, 1, 1]} : vector<2x16x128xf32> to vector<2x1x128xf32>
    %90 = vector.shape_cast %89 : vector<2x1x128xf32> to vector<2x128xf32>
    %91 = arith.maximumf %88, %90 : vector<2x128xf32>
    %92 = vector.extract_strided_slice %91 {offsets = [0, 0], sizes = [2, 64], strides = [1, 1]} : vector<2x128xf32> to vector<2x64xf32>
    %93 = vector.extract_strided_slice %91 {offsets = [0, 64], sizes = [2, 64], strides = [1, 1]} : vector<2x128xf32> to vector<2x64xf32>
    %94 = arith.maximumf %92, %93 : vector<2x64xf32>
    %95 = vector.extract_strided_slice %54 {offsets = [0, 10, 0], sizes = [2, 1, 128], strides = [1, 1, 1]} : vector<2x16x128xf32> to vector<2x1x128xf32>
    %96 = vector.shape_cast %95 : vector<2x1x128xf32> to vector<2x128xf32>
    %97 = vector.extract_strided_slice %54 {offsets = [0, 11, 0], sizes = [2, 1, 128], strides = [1, 1, 1]} : vector<2x16x128xf32> to vector<2x1x128xf32>
    %98 = vector.shape_cast %97 : vector<2x1x128xf32> to vector<2x128xf32>
    %99 = arith.maximumf %96, %98 : vector<2x128xf32>
    %100 = vector.extract_strided_slice %99 {offsets = [0, 0], sizes = [2, 64], strides = [1, 1]} : vector<2x128xf32> to vector<2x64xf32>
    %101 = vector.extract_strided_slice %99 {offsets = [0, 64], sizes = [2, 64], strides = [1, 1]} : vector<2x128xf32> to vector<2x64xf32>
    %102 = arith.maximumf %100, %101 : vector<2x64xf32>
    %103 = vector.extract_strided_slice %54 {offsets = [0, 12, 0], sizes = [2, 1, 128], strides = [1, 1, 1]} : vector<2x16x128xf32> to vector<2x1x128xf32>
    %104 = vector.shape_cast %103 : vector<2x1x128xf32> to vector<2x128xf32>
    %105 = vector.extract_strided_slice %54 {offsets = [0, 13, 0], sizes = [2, 1, 128], strides = [1, 1, 1]} : vector<2x16x128xf32> to vector<2x1x128xf32>
    %106 = vector.shape_cast %105 : vector<2x1x128xf32> to vector<2x128xf32>
    %107 = arith.maximumf %104, %106 : vector<2x128xf32>
    %108 = vector.extract_strided_slice %107 {offsets = [0, 0], sizes = [2, 64], strides = [1, 1]} : vector<2x128xf32> to vector<2x64xf32>
    %109 = vector.extract_strided_slice %107 {offsets = [0, 64], sizes = [2, 64], strides = [1, 1]} : vector<2x128xf32> to vector<2x64xf32>
    %110 = arith.maximumf %108, %109 : vector<2x64xf32>
    %111 = vector.extract_strided_slice %54 {offsets = [0, 14, 0], sizes = [2, 1, 128], strides = [1, 1, 1]} : vector<2x16x128xf32> to vector<2x1x128xf32>
    %112 = vector.shape_cast %111 : vector<2x1x128xf32> to vector<2x128xf32>
    %113 = vector.extract_strided_slice %54 {offsets = [0, 15, 0], sizes = [2, 1, 128], strides = [1, 1, 1]} : vector<2x16x128xf32> to vector<2x1x128xf32>
    %114 = vector.shape_cast %113 : vector<2x1x128xf32> to vector<2x128xf32>
    %115 = arith.maximumf %112, %114 : vector<2x128xf32>
    %116 = vector.extract_strided_slice %115 {offsets = [0, 0], sizes = [2, 64], strides = [1, 1]} : vector<2x128xf32> to vector<2x64xf32>
    %117 = vector.extract_strided_slice %115 {offsets = [0, 64], sizes = [2, 64], strides = [1, 1]} : vector<2x128xf32> to vector<2x64xf32>
    %118 = arith.maximumf %116, %117 : vector<2x64xf32>
    %119 = tpu.concatenate %62, %70, %78, %86, %94, %102, %110, %118 in 1 : vector<2x64xf32>, vector<2x64xf32>, vector<2x64xf32>, vector<2x64xf32>, vector<2x64xf32>, vector<2x64xf32>, vector<2x64xf32>, vector<2x64xf32> -> vector<2x512xf32>
    %120 = arith.truncf %119 : vector<2x512xf32> to vector<2x512xbf16>
    %c768 = arith.constant 768 : index
    %c0_35 = arith.constant 0 : index
    %121 = vector.load %arg2[%c768, %c0_35] : memref<1280x128xbf16, #tpu.memory_space<vmem>>, vector<512x128xbf16>
    %cst_36 = arith.constant dense<0.000000e+00> : vector<2x128xf32>
    %122 = tpu.matmul %120, %121, %cst_36 {dimension_numbers = #tpu.dot_dimension_numbers<[1], [0], [0], [1], [0, 0, 1, 1], [], []>} : vector<2x512xbf16>, vector<512x128xbf16>, vector<2x128xf32> -> vector<2x128xf32>
    %c1_37 = arith.constant 1 : index
    %c0_38 = arith.constant 0 : index
    %123 = vector.load %arg3[%c1_37, %c0_38] : memref<136x128xf32, #tpu.memory_space<vmem>>, vector<1x128xf32>
    %124 = vector.broadcast %123 : vector<1x128xf32> to vector<2x128xf32>
    %125 = arith.addf %122, %124 : vector<2x128xf32>
    %126 = math.tanh %125 : vector<2x128xf32>
    %c8 = arith.constant 8 : index
    %c0_39 = arith.constant 0 : index
    %127 = vector.load %arg3[%c8, %c0_39] : memref<136x128xf32, #tpu.memory_space<vmem>>, vector<128x2xf32>
    %cst_40 = arith.constant dense<0.000000e+00> : vector<2x2xf32>
    %128 = tpu.matmul %126, %127, %cst_40 {dimension_numbers = #tpu.dot_dimension_numbers<[1], [0], [0], [1], [0, 0, 1, 1], [], []>} : vector<2x128xf32>, vector<128x2xf32>, vector<2x2xf32> -> vector<2x2xf32>
    %c2_41 = arith.constant 2 : index
    %c0_42 = arith.constant 0 : index
    %129 = vector.load %arg3[%c2_41, %c0_42] : memref<136x128xf32, #tpu.memory_space<vmem>>, vector<1x2xf32>
    %130 = vector.broadcast %129 : vector<1x2xf32> to vector<2x2xf32>
    %131 = arith.addf %128, %130 : vector<2x2xf32>
    %c0_43 = arith.constant 0 : index
    %c0_44 = arith.constant 0 : index
    %132 = vector.load %arg4[%c0_43, %c0_44] : memref<2x2xf32, #tpu.memory_space<vmem>>, vector<2x2xf32>
    tpu.vector_store %arg4[%c0_43, %c0_44], %131 {strides = array<i32>} : memref<2x2xf32, #tpu.memory_space<vmem>>, vector<2x2xf32>,
    return
  }
}

</mosaic_0001>

<bundles_post_ra>
// kernel: net_forward_pallas.1
= control target key start
LH: loop header
LB: loop body
LE: loop exit
PB: predicated region body
PF: predicated region fallthrough
CT: control target
= control target key end

     0   :  { %s4816_s0 = inlined_call_operand.vmem [shape: bf16[4,32,128], index: 0, kind: input, shape index: {}]   ;;  %s4817_s1 = inlined_call_operand.vmem [shape: bf16[3,128,512], index: 1, kind: input, shape index: {}]   ;;  %s4818_s2 = inlined_call_operand.vmem [shape: bf16[1280,128], index: 2, kind: input, shape index: {}]   ;;  %s4819_s3 = inlined_call_operand.vmem [shape: f32[136,128], index: 3, kind: input, shape index: {}]   ;;  %s4820_s4 = inlined_call_operand.hbm [shape: f32[2,2], index: 4, kind: output, shape index: {}]  }
   0x1   :  { %v2414_v0 = vld [vmem:[%s4817_s1 + $0x1e0] sm:$0xf]  ;;  %v3098_v1 = vld [vmem:[%s4817_s1 + $0x1ec] sm:$0xf0]  ;;  %v3096_v2 = vld [vmem:[%s4817_s1 + $0x1e4] sm:$0xf] }
   0x2   :  { %v3301_v3 = vor.u32 %v3098_v1, %v2414_v0  ;;  %v2416_v4 = vld [vmem:[%s4817_s1 + $0x1f0] sm:$0xf0]  ;;  %v2422_v5 = vld [vmem:[%s4817_s1 + $0x1e8] sm:$0xf]  ;;  %v3099_v6 = vld [vmem:[%s4817_s1 + $0x1f4] sm:$0xf0] }
   0x3   :  { %v3312_v7 = vor.u32 %v3096_v2, %v2416_v4  ;;  %v3314_v8 = vor.u32 %v3099_v6, %v2422_v5  ;;  %v3097_v9 = vld [vmem:[%s4817_s1 + $0x1ec] sm:$0xf]  ;;  %v2424_v10 = vld [vmem:[%s4817_s1 + $0x1f8] sm:$0xf0]  ;;  %v2398_v11 = vld [vmem:[%s4817_s1 + $0x1c0] sm:$0xf] }
   0x4   :  { %307 = vmatpush.bf16.msra.mxu0 %v3301_v3  ;;  %v3326_v12 = vor.u32 %v3097_v9, %v2424_v10  ;;  %v3094_v13 = vld [vmem:[%s4817_s1 + $0x1cc] sm:$0xf0]  ;;  %v3092_v14 = vld [vmem:[%s4817_s1 + $0x1c4] sm:$0xf]  ;;  %v2400_v15 = vld [vmem:[%s4817_s1 + $0x1d0] sm:$0xf0] }
   0x5   :  { %326 = vmatpush.bf16.msra.mxu1 %v3312_v7  ;;  %345 = vmatpush.bf16.msra.mxu2 %v3314_v8  ;;  %v3339_v16 = vor.u32 %v3094_v13, %v2398_v11  ;;  %v3341_v17 = vor.u32 %v3092_v14, %v2400_v15  ;;  %v2406_v18 = vld [vmem:[%s4817_s1 + $0x1c8] sm:$0xf]  ;;  %v3095_v19 = vld [vmem:[%s4817_s1 + $0x1d4] sm:$0xf0]  ;;  %v3093_v20 = vld [vmem:[%s4817_s1 + $0x1cc] sm:$0xf] }
   0x6   :  { %364 = vmatpush.bf16.msra.mxu3 %v3326_v12  ;;  %v3353_v21 = vor.u32 %v3095_v19, %v2406_v18  ;;  %v2408_v22 = vld [vmem:[%s4817_s1 + $0x1d8] sm:$0xf0]  ;;  %v2382_v23 = vld [vmem:[%s4817_s1 + $0x1a0] sm:$0xf]  ;;  %v3090_v24 = vld [vmem:[%s4817_s1 + $0x1ac] sm:$0xf0] }
   0x7   :  { %v3364_v25 = vor.u32 %v3093_v20, %v2408_v22  ;;  %v3088_v26 = vld [vmem:[%s4817_s1 + $0x1a4] sm:$0xf]  ;;  %v2384_v27 = vld [vmem:[%s4817_s1 + $0x1b0] sm:$0xf0]  ;;  %v2390_v28 = vld [vmem:[%s4817_s1 + $0x1a8] sm:$0xf]  ;;  %v3376_v29 = vor.u32 %v3090_v24, %v2382_v23 }
   0x8   :  { %308 = vmatpush.bf16.msra.mxu0 %v3339_v16  ;;  %v3091_v30 = vld [vmem:[%s4817_s1 + $0x1b4] sm:$0xf0]  ;;  %v3089_v31 = vld [vmem:[%s4817_s1 + $0x1ac] sm:$0xf]  ;;  %v2392_v32 = vld [vmem:[%s4817_s1 + $0x1b8] sm:$0xf0]  ;;  %v3389_v33 = vor.u32 %v3088_v26, %v2384_v27 }
   0x9   :  { %327 = vmatpush.bf16.msra.mxu1 %v3341_v17  ;;  %346 = vmatpush.bf16.msra.mxu2 %v3353_v21  ;;  %v3391_v34 = vor.u32 %v3091_v30, %v2390_v28  ;;  %v2366_v35 = vld [vmem:[%s4817_s1 + $0x180] sm:$0xf]  ;;  %v3086_v36 = vld [vmem:[%s4817_s1 + $0x18c] sm:$0xf0]  ;;  %v3084_v37 = vld [vmem:[%s4817_s1 + $0x184] sm:$0xf]  ;;  %v3403_v38 = vor.u32 %v3089_v31, %v2392_v32 }
   0xa   :  { %365 = vmatpush.bf16.msra.mxu3 %v3364_v25  ;;  %v2368_v39 = vld [vmem:[%s4817_s1 + $0x190] sm:$0xf0]  ;;  %v2374_v40 = vld [vmem:[%s4817_s1 + $0x188] sm:$0xf]  ;;  %v3087_v41 = vld [vmem:[%s4817_s1 + $0x194] sm:$0xf0]  ;;  %v3421_v44 = vor.u32 %v3086_v36, %v2366_v35 }
   0xb   :  { %v3085_v42 = vld [vmem:[%s4817_s1 + $0x18c] sm:$0xf]  ;;  %v2376_v43 = vld [vmem:[%s4817_s1 + $0x198] sm:$0xf0]  ;;  %v3425_v45 = vor.u32 %v3084_v37, %v2368_v39  ;;  %v3427_v46 = vor.u32 %v3087_v41, %v2374_v40  ;;  %v2350_v47 = vld [vmem:[%s4817_s1 + $0x160] sm:$0xf] }
   0xc   :  { %309 = vmatpush.bf16.msra.mxu0 %v3376_v29  ;;  %v3082_v48 = vld [vmem:[%s4817_s1 + $0x16c] sm:$0xf0]  ;;  %v3080_v49 = vld [vmem:[%s4817_s1 + $0x164] sm:$0xf]  ;;  %v3439_v50 = vor.u32 %v3085_v42, %v2376_v43  ;;  %v2352_v51 = vld [vmem:[%s4817_s1 + $0x170] sm:$0xf0] }
   0xd   :  { %328 = vmatpush.bf16.msra.mxu1 %v3389_v33  ;;  %347 = vmatpush.bf16.msra.mxu2 %v3391_v34  ;;  %v2358_v52 = vld [vmem:[%s4817_s1 + $0x168] sm:$0xf]  ;;  %v3083_v53 = vld [vmem:[%s4817_s1 + $0x174] sm:$0xf0]  ;;  %v3081_v54 = vld [vmem:[%s4817_s1 + $0x16c] sm:$0xf]  ;;  %v3457_v56 = vor.u32 %v3082_v48, %v2350_v47  ;;  %v3461_v57 = vor.u32 %v3080_v49, %v2352_v51 }
   0xe   :  { %366 = vmatpush.bf16.msra.mxu3 %v3403_v38  ;;  %v2360_v55 = vld [vmem:[%s4817_s1 + $0x178] sm:$0xf0]  ;;  %v3463_v58 = vor.u32 %v3083_v53, %v2358_v52  ;;  %v2334_v59 = vld [vmem:[%s4817_s1 + $0x140] sm:$0xf]  ;;  %v3078_v60 = vld [vmem:[%s4817_s1 + $0x14c] sm:$0xf0] }
   0xf   :  { %v3076_v61 = vld [vmem:[%s4817_s1 + $0x144] sm:$0xf]  ;;  %v3475_v62 = vor.u32 %v3081_v54, %v2360_v55  ;;  %v2336_v63 = vld [vmem:[%s4817_s1 + $0x150] sm:$0xf0]  ;;  %v2342_v0 = vld [vmem:[%s4817_s1 + $0x148] sm:$0xf]  ;;  %v3493_v5 = vor.u32 %v3078_v60, %v2334_v59 }
  0x10   :  { %310 = vmatpush.bf16.msra.mxu0 %v3421_v44  ;;  %v3079_v1 = vld [vmem:[%s4817_s1 + $0x154] sm:$0xf0]  ;;  %v3077_v2 = vld [vmem:[%s4817_s1 + $0x14c] sm:$0xf]  ;;  %v2344_v4 = vld [vmem:[%s4817_s1 + $0x158] sm:$0xf0]  ;;  %v3497_v6 = vor.u32 %v3076_v61, %v2336_v63 }
  0x11   :  { %329 = vmatpush.bf16.msra.mxu1 %v3425_v45  ;;  %348 = vmatpush.bf16.msra.mxu2 %v3427_v46  ;;  %v3499_v9 = vor.u32 %v3079_v1, %v2342_v0  ;;  %v2318_v10 = vld [vmem:[%s4817_s1 + $0x120] sm:$0xf]  ;;  %v3074_v11 = vld [vmem:[%s4817_s1 + $0x12c] sm:$0xf0]  ;;  %v3072_v13 = vld [vmem:[%s4817_s1 + $0x124] sm:$0xf]  ;;  %v3511_v14 = vor.u32 %v3077_v2, %v2344_v4 }
  0x12   :  { %367 = vmatpush.bf16.msra.mxu3 %v3439_v50  ;;  %v2320_v15 = vld [vmem:[%s4817_s1 + $0x130] sm:$0xf0]  ;;  %v2326_v18 = vld [vmem:[%s4817_s1 + $0x128] sm:$0xf]  ;;  %v3075_v19 = vld [vmem:[%s4817_s1 + $0x134] sm:$0xf0]  ;;  %v3529_v23 = vor.u32 %v3074_v11, %v2318_v10 }
  0x13   :  { %v3073_v20 = vld [vmem:[%s4817_s1 + $0x12c] sm:$0xf]  ;;  %v2328_v22 = vld [vmem:[%s4817_s1 + $0x138] sm:$0xf0]  ;;  %v2302_v24 = vld [vmem:[%s4817_s1 + $0x100] sm:$0xf]  ;;  %v3536_v26 = vor.u32 %v3072_v13, %v2320_v15  ;;  %v3538_v27 = vor.u32 %v3075_v19, %v2326_v18 }
  0x14   :  { %311 = vmatpush.bf16.msra.mxu0 %v3457_v56  ;;  %v3070_v28 = vld [vmem:[%s4817_s1 + $0x10c] sm:$0xf0]  ;;  %v3068_v30 = vld [vmem:[%s4817_s1 + $0x104] sm:$0xf]  ;;  %v2304_v31 = vld [vmem:[%s4817_s1 + $0x110] sm:$0xf0]  ;;  %v3550_v32 = vor.u32 %v3073_v20, %v2328_v22 }
  0x15   :  { %330 = vmatpush.bf16.msra.mxu1 %v3461_v57  ;;  %349 = vmatpush.bf16.msra.mxu2 %v3463_v58  ;;  %v2310_v35 = vld [vmem:[%s4817_s1 + $0x108] sm:$0xf]  ;;  %v3071_v36 = vld [vmem:[%s4817_s1 + $0x114] sm:$0xf0]  ;;  %v3069_v37 = vld [vmem:[%s4817_s1 + $0x10c] sm:$0xf]  ;;  %v3571_v42 = vor.u32 %v3070_v28, %v2302_v24  ;;  %v3581_v48 = vor.u32 %v3068_v30, %v2304_v31 }
  0x16   :  { %368 = vmatpush.bf16.msra.mxu3 %v3475_v62  ;;  %v2312_v39 = vld [vmem:[%s4817_s1 + $0x118] sm:$0xf0]  ;;  %v2558_v40 = vld [vmem:[%s4817_s1 + $0xe8] sm:$0xf]  ;;  %v3067_v41 = vld [vmem:[%s4817_s1 + $0xf4] sm:$0xf0]  ;;  %v3583_v49 = vor.u32 %v3071_v36, %v2310_v35 }
  0x17   :  { %v3065_v43 = vld [vmem:[%s4817_s1 + $0xec] sm:$0xf]  ;;  %v2560_v47 = vld [vmem:[%s4817_s1 + $0xf8] sm:$0xf0]  ;;  %v3588_v51 = vld [vmem:[%s4816_s0 + $0x20] sm:$0xff]  ;;  %v3591_v52 = vor.u32 %v3069_v37, %v2312_v39  ;;  %v3593_v53 = vor.u32 %v3067_v41, %v2558_v40 }
  0x18   :  { %312 = vmatpush.bf16.msra.mxu0 %v3493_v5  ;;  %4864 = vst [vmem:[#allocation5_spill] sm:$0xff] %v3588_v51  ;;  %v2550_v54 = vld [vmem:[%s4817_s1 + $0xe0] sm:$0xf]  ;;  %v3066_v55 = vld [vmem:[%s4817_s1 + $0xec] sm:$0xf0]  ;;  %v3604_v60 = vor.u32 %v3065_v43, %v2560_v47 }
  0x19   :  { %331 = vmatpush.bf16.msra.mxu1 %v3497_v6  ;;  %350 = vmatpush.bf16.msra.mxu2 %v3499_v9  ;;  %v3064_v59 = vld [vmem:[%s4817_s1 + $0xe4] sm:$0xf]  ;;  %v2552_v61 = vld [vmem:[%s4817_s1 + $0xf0] sm:$0xf0]  ;;  %v2542_v63 = vld [vmem:[%s4817_s1 + $0xc8] sm:$0xf]  ;;  %v3624_v4 = vor.u32 %v3066_v55, %v2550_v54 }
  0x1a   :  { %369 = vmatpush.bf16.msra.mxu3 %v3511_v14  ;;  %v3063_v0 = vld [vmem:[%s4817_s1 + $0xd4] sm:$0xf0]  ;;  %v3061_v1 = vld [vmem:[%s4817_s1 + $0xcc] sm:$0xf]  ;;  %v2544_v2 = vld [vmem:[%s4817_s1 + $0xd8] sm:$0xf0]  ;;  %v3628_v10 = vor.u32 %v3064_v59, %v2552_v61 }
  0x1b   :  { %v3630_v11 = vor.u32 %v3063_v0, %v2542_v63  ;;  %v2534_v13 = vld [vmem:[%s4817_s1 + $0xc0] sm:$0xf]  ;;  %v3062_v15 = vld [vmem:[%s4817_s1 + $0xcc] sm:$0xf0]  ;;  %v3060_v18 = vld [vmem:[%s4817_s1 + $0xc4] sm:$0xf]  ;;  %v3643_v19 = vor.u32 %v3061_v1, %v2544_v2 }
  0x1c   :  { %313 = vmatpush.bf16.msra.mxu0 %v3529_v23  ;;  %v2536_v20 = vld [vmem:[%s4817_s1 + $0xd0] sm:$0xf0]  ;;  %v2526_v22 = vld [vmem:[%s4817_s1 + $0xa8] sm:$0xf]  ;;  %v3059_v24 = vld [vmem:[%s4817_s1 + $0xb4] sm:$0xf0]  ;;  %v3664_v31 = vor.u32 %v3062_v15, %v2534_v13 }
  0x1d   :  { %332 = vmatpush.bf16.msra.mxu1 %v3536_v26  ;;  %351 = vmatpush.bf16.msra.mxu2 %v3538_v27  ;;  %v3057_v28 = vld [vmem:[%s4817_s1 + $0xac] sm:$0xf]  ;;  %v2528_v30 = vld [vmem:[%s4817_s1 + $0xb8] sm:$0xf0]  ;;  %v3668_v35 = vor.u32 %v3060_v18, %v2536_v20  ;;  %v3670_v36 = vor.u32 %v3059_v24, %v2526_v22  ;;  %v2518_v37 = vld [vmem:[%s4817_s1 + $0xa0] sm:$0xf] }
  0x1e   :  { %370 = vmatpush.bf16.msra.mxu3 %v3550_v32  ;;  %v3058_v39 = vld [vmem:[%s4817_s1 + $0xac] sm:$0xf0]  ;;  %v3056_v40 = vld [vmem:[%s4817_s1 + $0xa4] sm:$0xf]  ;;  %v3682_v41 = vor.u32 %v3057_v28, %v2528_v30  ;;  %v2520_v43 = vld [vmem:[%s4817_s1 + $0xb0] sm:$0xf0] }
  0x1f   :  { %v2510_v47 = vld [vmem:[%s4817_s1 + $0x88] sm:$0xf]  ;;  %v3055_v54 = vld [vmem:[%s4817_s1 + $0x94] sm:$0xf0]  ;;  %v3053_v55 = vld [vmem:[%s4817_s1 + $0x8c] sm:$0xf]  ;;  %v3700_v61 = vor.u32 %v3058_v39, %v2518_v37  ;;  %v3704_v63 = vor.u32 %v3056_v40, %v2520_v43 }
  0x20   :  { %314 = vmatpush.bf16.msra.mxu0 %v3571_v42  ;;  %v2512_v59 = vld [vmem:[%s4817_s1 + $0x98] sm:$0xf0]  ;;  %v3706_v0 = vor.u32 %v3055_v54, %v2510_v47  ;;  %v2502_v1 = vld [vmem:[%s4817_s1 + $0x80] sm:$0xf]  ;;  %v3054_v2 = vld [vmem:[%s4817_s1 + $0x8c] sm:$0xf0] }
  0x21   :  { %333 = vmatpush.bf16.msra.mxu1 %v3581_v48  ;;  %352 = vmatpush.bf16.msra.mxu2 %v3583_v49  ;;  %4865 = vst [vmem:[#allocation6_spill] sm:$0xff] %v3704_v63  ;;  %v3052_v13 = vld [vmem:[%s4817_s1 + $0x84] sm:$0xf]  ;;  %v3718_v15 = vor.u32 %v3053_v55, %v2512_v59  ;;  %v2504_v18 = vld [vmem:[%s4817_s1 + $0x90] sm:$0xf0]  ;;  %v3736_v30 = vor.u32 %v3054_v2, %v2502_v1  ;;  %v3741_v37 = vld [vmem:[%s4816_s0 + $0x28] sm:$0xff] }
  0x22   :  { %371 = vmatpush.bf16.msra.mxu3 %v3591_v52  ;;  %4866 = vst [vmem:[#allocation7_spill] sm:$0xff] %v3706_v0  ;;  %v2494_v20 = vld [vmem:[%s4817_s1 + $0x68] sm:$0xf]  ;;  %v3051_v22 = vld [vmem:[%s4817_s1 + $0x74] sm:$0xf0]  ;;  %v3745_v39 = vor.u32 %v3052_v13, %v2504_v18 }
  0x23   :  { %315 = vmatmul.bf16.vlgmr.msra.gmra.mxu0 %v3588_v51  ;;  %4867 = vst [vmem:[#allocation8_spill] sm:$0xff] %v3718_v15  ;;  %v3049_v24 = vld [vmem:[%s4817_s1 + $0x6c] sm:$0xf]  ;;  %v2496_v28 = vld [vmem:[%s4817_s1 + $0x78] sm:$0xf0]  ;;  %v3747_v40 = vor.u32 %v3051_v22, %v2494_v20 }
  0x24   :  { %334 = vmatmul.bf16.vlgmr.msra.gmra.mxu1 %v3588_v51  ;;  %353 = vmatmul.bf16.vlgmr.msra.gmra.mxu2 %v3588_v51  ;;  %4868 = vst [vmem:[#allocation9_spill] sm:$0xff] %v3736_v30  ;;  %v2486_v43 = vld [vmem:[%s4817_s1 + $0x60] sm:$0xf]  ;;  %v3050_v47 = vld [vmem:[%s4817_s1 + $0x6c] sm:$0xf0]  ;;  %v3759_v55 = vor.u32 %v3049_v24, %v2496_v28 }
  0x25   :  { %593 = vmatpush.bf16.msrb.mxu2 %v3593_v53  ;;  %372 = vmatmul.bf16.vlgmr.msra.gmra.mxu3 %v3588_v51  ;;  %4869 = vst [vmem:[#allocation10_spill] sm:$0xff] %v3741_v37  ;;  %v3048_v54 = vld [vmem:[%s4817_s1 + $0x64] sm:$0xf]  ;;  %v2488_v59 = vld [vmem:[%s4817_s1 + $0x70] sm:$0xf0]  ;;  %v3777_v20 = vor.u32 %v3050_v47, %v2486_v43 }
  0x26   :  { %612 = vmatpush.bf16.msrb.mxu3 %v3604_v60  ;;  %555 = vmatpush.bf16.msrb.mxu0 %v3624_v4  ;;  %4870 = vst [vmem:[#allocation11_spill] sm:$0xff] %v3745_v39  ;;  %v2478_v1 = vld [vmem:[%s4817_s1 + $0x48] sm:$0xf]  ;;  %v3047_v2 = vld [vmem:[%s4817_s1 + $0x54] sm:$0xf0]  ;;  %v3781_v22 = vor.u32 %v3048_v54, %v2488_v59 }
  0x27   :  { %574 = vmatpush.bf16.msrb.mxu1 %v3628_v10  ;;  %4871 = vst [vmem:[#allocation12_spill] sm:$0xff] %v3747_v40  ;;  %v3045_v13 = vld [vmem:[%s4817_s1 + $0x4c] sm:$0xf]  ;;  %v2480_v18 = vld [vmem:[%s4817_s1 + $0x58] sm:$0xf0]  ;;  %v3783_v24 = vor.u32 %v3047_v2, %v2478_v1 }
  0x28   :  { %4872 = vst [vmem:[#allocation13_spill] sm:$0xff] %v3759_v55  ;;  %v2470_v28 = vld [vmem:[%s4817_s1 + $0x40] sm:$0xf]  ;;  %v3046_v51 = vld [vmem:[%s4817_s1 + $0x4c] sm:$0xf0]  ;;  %v3796_v47 = vor.u32 %v3045_v13, %v2480_v18 }
  0x29   :  { %594 = vmatpush.bf16.msrb.mxu2 %v3630_v11  ;;  %4873 = vst [vmem:[#allocation14_spill] sm:$0xff] %v3777_v20  ;;  %v3044_v43 = vld [vmem:[%s4817_s1 + $0x44] sm:$0xf]  ;;  %v2472_v54 = vld [vmem:[%s4817_s1 + $0x50] sm:$0xf0]  ;;  %v3817_v18 = vor.u32 %v3046_v51, %v2470_v28 }
  0x2a   :  { %613 = vmatpush.bf16.msrb.mxu3 %v3643_v19  ;;  %556 = vmatpush.bf16.msrb.mxu0 %v3664_v31  ;;  %4874 = vst [vmem:[#allocation15_spill] sm:$0xff] %v3781_v22  ;;  %v2462_v59 = vld [vmem:[%s4817_s1 + $0x28] sm:$0xf]  ;;  %v3043_v1 = vld [vmem:[%s4817_s1 + $0x34] sm:$0xf0] }
  0x2b   :  { %575 = vmatpush.bf16.msrb.mxu1 %v3668_v35  ;;  %4875 = vst [vmem:[#allocation16_spill] sm:$0xff] %v3783_v24  ;;  %v3041_v2 = vld [vmem:[%s4817_s1 + $0x2c] sm:$0xf]  ;;  %v2464_v13 = vld [vmem:[%s4817_s1 + $0x38] sm:$0xf0] }
  0x2c   :  { %4876 = vst [vmem:[#allocation17_spill] sm:$0xff] %v3796_v47  ;;  %v3040_v51 = vld [vmem:[%s4817_s1 + $0x24] sm:$0xf]  ;;  %v2456_v28 = vld [vmem:[%s4817_s1 + $0x30] sm:$0xf0] }
  0x2d   :  { %595 = vmatpush.bf16.msrb.mxu2 %v3670_v36  ;;  %4877 = vst [vmem:[#allocation18_spill] sm:$0xff] %v3817_v18 }
  0x2e   :  { %614 = vmatpush.bf16.msrb.mxu3 %v3682_v41  ;;  %557 = vmatpush.bf16.msrb.mxu0 %v3700_v61 }
  0x2f   :  { %576 = vmatpush.bf16.msrb.mxu1 %v3704_v63  ;;  %v3125_v63 = vld [vmem:[%s4817_s1 + $0x2cc] sm:$0xf] }
  0x31   :  { %596 = vmatpush.bf16.msrb.mxu2 %v3706_v0  ;;  %v2440_v0 = vld [vmem:[%s4817_s1 + $0x10] sm:$0xf0] }
  0x32   :  { %615 = vmatpush.bf16.msrb.mxu3 %v3718_v15  ;;  %558 = vmatpush.bf16.msrb.mxu0 %v3736_v30  ;;  %v2696_v30 = vld [vmem:[%s4817_s1 + $0x2f8] sm:$0xf0]  ;;  %v3872_v15 = vor.u32 %v3040_v51, %v2456_v28  ;;  %v2686_v28 = vld [vmem:[%s4817_s1 + $0x2e0] sm:$0xf] }
  0x33   :  { %577 = vmatpush.bf16.msrb.mxu1 %v3745_v39  ;;  %320 = vmatmul.bf16.gmra.mxu0 %v3741_v37  ;;  %v3826_v39 = vor.u32 %v3043_v1, %v2462_v59  ;;  %v3037_v59 = vld [vmem:[%s4817_s1 + $0xc] sm:$0xf]  ;;  %v2448_v1 = vld [vmem:[%s4817_s1 + $0x18] sm:$0xf0] }
  0x34   :  { %339 = vmatmul.bf16.gmra.mxu1 %v3741_v37  ;;  %358 = vmatmul.bf16.gmra.mxu2 %v3741_v37  ;;  %4882 = vst [vmem:[#allocation23_spill] sm:$0xff] %v3872_v15 }
  0x35   :  { %597 = vmatpush.bf16.msrb.mxu2 %v3747_v40  ;;  %377 = vmatmul.bf16.gmra.mxu3 %v3741_v37  ;;  %v3824_v40 = vor.u32 %v3044_v43, %v2472_v54  ;;  %4879 = vst [vmem:[#allocation20_spill] sm:$0xff] %v3826_v39  ;;  %v3042_v37 = vld [vmem:[%s4817_s1 + $0x2c] sm:$0xf0]  ;;  %v2446_v43 = vld [vmem:[%s4817_s1 + $0x8] sm:$0xf] }
  0x36   :  { %616 = vmatpush.bf16.msrb.mxu3 %v3759_v55  ;;  %559 = vmatpush.bf16.msrb.mxu0 %v3777_v20  ;;  %v2454_v55 = vld [vmem:[%s4817_s1 + $0x20] sm:$0xf]  ;;  %v3039_v54 = vld [vmem:[%s4817_s1 + $0x14] sm:$0xf0]  ;;  %v3129_v20 = vld [vmem:[%s4817_s1 + $0x2ec] sm:$0xf] }
  0x37   :  { %578 = vmatpush.bf16.msrb.mxu1 %v3781_v22  ;;  %4878 = vst [vmem:[#allocation19_spill] sm:$0xff] %v3824_v40  ;;  %v3838_v22 = vor.u32 %v3041_v2, %v2464_v13  ;;  %v2694_v2 = vld [vmem:[%s4817_s1 + $0x2e8] sm:$0xf]  ;;  %v3131_v13 = vld [vmem:[%s4817_s1 + $0x2f4] sm:$0xf0] }
  0x38   :  { %v3888_v51 = vor.u32 %v3131_v13, %v2694_v2  ;;  %v3127_v2 = vld [vmem:[%s4817_s1 + $0x2d4] sm:$0xf0] }
  0x39   :  { %598 = vmatpush.bf16.msrb.mxu2 %v3783_v24  ;;  %4880 = vst [vmem:[#allocation21_spill] sm:$0xff] %v3838_v22  ;;  %v2438_v24 = vld [vmem:[%s4817_s1] sm:$0xf] }
  0x3a   :  { %617 = vmatpush.bf16.msrb.mxu3 %v3796_v47  ;;  %560 = vmatpush.bf16.msrb.mxu0 %v3817_v18  ;;  %v3859_v47 = vor.u32 %v3042_v37, %v2454_v55  ;;  %v3874_v37 = vor.u32 %v3039_v54, %v2446_v43  ;;  %v3038_v55 = vld [vmem:[%s4817_s1 + $0xc] sm:$0xf0]  ;;  %v3036_v18 = vld [vmem:[%s4817_s1 + $0x4] sm:$0xf]  ;;  %4885 = vst [vmem:[#allocation26_spill] sm:$0xff] %v3888_v51 }
  0x3b   :  { %579 = vmatpush.bf16.msrb.mxu1 %v3824_v40  ;;  %v3886_v40 = vor.u32 %v3037_v59, %v2448_v1  ;;  %v3130_v43 = vld [vmem:[%s4817_s1 + $0x2ec] sm:$0xf0]  ;;  %v3128_v54 = vld [vmem:[%s4817_s1 + $0x2e4] sm:$0xf]  ;;  %v2688_v59 = vld [vmem:[%s4817_s1 + $0x2f0] sm:$0xf0]  ;;  %v3911_v13 = vor.u32 %v3038_v55, %v2438_v24 }
  0x3c   :  { %4881 = vst [vmem:[#allocation22_spill] sm:$0xff] %v3859_v47  ;;  %v2678_v1 = vld [vmem:[%s4817_s1 + $0x2c8] sm:$0xf]  ;;  %v2680_v24 = vld [vmem:[%s4817_s1 + $0x2d8] sm:$0xf0] }
  0x3d   :  { %599 = vmatpush.bf16.msrb.mxu2 %v3826_v39  ;;  %4883 = vst [vmem:[#allocation24_spill] sm:$0xff] %v3874_v37  ;;  %v3899_v39 = vor.u32 %v3129_v20, %v2696_v30  ;;  %v3915_v30 = vor.u32 %v3036_v18, %v2440_v0  ;;  %v3028_v20 = vld [vmem:[%s4816_s0] sm:$0xff]  ;;  %v3930_v0 = vor.u32 %v3128_v54, %v2688_v59  ;;  %v2672_v54 = vld [vmem:[%s4817_s1 + $0x2d0] sm:$0xf0]  ;;  %v2662_v59 = vld [vmem:[%s4817_s1 + $0x2a8] sm:$0xf] }
  0x3e   :  { %618 = vmatpush.bf16.msrb.mxu3 %v3838_v22  ;;  %4884 = vst [vmem:[#allocation25_spill] sm:$0xff] %v3886_v40  ;;  %561 = vmatpush.bf16.msrb.mxu0 %v3859_v47  ;;  %v3920_v22 = vor.u32 %v3130_v43, %v2686_v28  ;;  %v3932_v18 = vor.u32 %v3127_v2, %v2678_v1  ;;  %v2670_v55 = vld [vmem:[%s4817_s1 + $0x2c0] sm:$0xf]  ;;  %v3126_v28 = vld [vmem:[%s4817_s1 + $0x2cc] sm:$0xf0] }
  0x3f   :  { %4886 = vst [vmem:[#allocation27_spill] sm:$0xff] %v3899_v39  ;;  %580 = vmatpush.bf16.msrb.mxu1 %v3872_v15  ;;  %v3124_v43 = vld [vmem:[%s4817_s1 + $0x2c4] sm:$0xf]  ;;  %v3123_v1 = vld [vmem:[%s4817_s1 + $0x2b4] sm:$0xf0] }
  0x40   :  { %4887 = vst [vmem:[#allocation28_spill] sm:$0xff] %v3911_v13  ;;  %v3121_v2 = vld [vmem:[%s4817_s1 + $0x2ac] sm:$0xf]  ;;  %v3120_v15 = vld [vmem:[%s4817_s1 + $0x2a4] sm:$0xf]  ;;  %v3977_v47 = vor.u32 %v3124_v43, %v2672_v54 }
  0x41   :  { %600 = vmatpush.bf16.msrb.mxu2 %v3874_v37  ;;  %4888 = vst [vmem:[#allocation29_spill] sm:$0xff] %v3915_v30  ;;  %v3967_v37 = vor.u32 %v3126_v28, %v2670_v55 }
  0x42   :  { %619 = vmatpush.bf16.msrb.mxu3 %v3886_v40  ;;  %562 = vmatpush.bf16.msrb.mxu0 %v3911_v13  ;;  %v3965_v40 = vor.u32 %v3125_v63, %v2680_v24  ;;  %v3122_v13 = vld [vmem:[%s4817_s1 + $0x2ac] sm:$0xf0]  ;;  %4891 = vst [vmem:[#allocation32_spill] sm:$0xff] %v3977_v47 }
  0x43   :  { %581 = vmatpush.bf16.msrb.mxu1 %v3915_v30  ;;  %4890 = vst [vmem:[#allocation31_spill] sm:$0xff] %v3967_v37  ;;  %v3979_v30 = vor.u32 %v3123_v1, %v2662_v59 }
  0x44   :  { %4889 = vst [vmem:[#allocation30_spill] sm:$0xff] %v3965_v40 }
  0x45   :  { %841 = vmatpush.bf16.msra.mxu2 %v3888_v51  ;;  %v2654_v51 = vld [vmem:[%s4817_s1 + $0x2a0] sm:$0xf]  ;;  %4892 = vst [vmem:[#allocation33_spill] sm:$0xff] %v3979_v30 }
  0x46   :  { %860 = vmatpush.bf16.msra.mxu3 %v3899_v39  ;;  %v2664_v39 = vld [vmem:[%s4817_s1 + $0x2b8] sm:$0xf0]  ;;  %803 = vmatpush.bf16.msra.mxu0 %v3920_v22 }
  0x47   :  { %822 = vmatpush.bf16.msra.mxu1 %v3930_v0 }
  0x49   :  { %842 = vmatpush.bf16.msra.mxu2 %v3932_v18 }
  0x4a   :  { %9 = vsyncpa [#allocation3], 0  ;;  %563 = vmatmul.bf16.vlgmr.msrb.gmra.mxu0 %v3028_v20  ;;  %601 = vmatmul.bf16.vlgmr.msrb.gmra.mxu2 %v3028_v20  ;;  %v2656_v63 = vld [vmem:[%s4817_s1 + $0x2b0] sm:$0xf0]  ;;  %v2646_v24 = vld [vmem:[%s4817_s1 + $0x288] sm:$0xf]  ;;  %v3992_v28 = vor.u32 %v3121_v2, %v2664_v39  ;;  %v3994_v43 = vor.u32 %v3122_v13, %v2654_v51 }
  0x4b   :  { %v3119_v55 = vld [vmem:[%s4817_s1 + $0x294] sm:$0xf0]  ;;  %582 = vmatmul.bf16.vlgmr.msrb.gmra.mxu1 %v3028_v20  ;;  %620 = vmatmul.bf16.vlgmr.msrb.gmra.mxu3 %v3028_v20  ;;  %v3117_v54 = vld [vmem:[%s4817_s1 + $0x28c] sm:$0xf]  ;;  %v2648_v59 = vld [vmem:[%s4817_s1 + $0x298] sm:$0xf0]  ;;  %v4004_v20 = vor.u32 %v3120_v15, %v2656_v63 }
  0x4c   :  { %861 = vmatpush.bf16.msra.mxu3 %v3965_v40  ;;  %804 = vmatpush.bf16.msra.mxu0 %v3967_v37  ;;  %4893 = vst [vmem:[#allocation34_spill] sm:$0xff] %v3992_v28  ;;  %v4006_v1 = vor.u32 %v3119_v55, %v2646_v24  ;;  %v2638_v39 = vld [vmem:[%s4817_s1 + $0x280] sm:$0xf]  ;;  %v3118_v51 = vld [vmem:[%s4817_s1 + $0x28c] sm:$0xf0]  ;;  %v4028_v24 = vor.u32 %v3117_v54, %v2648_v59  ;;  %vm1713_vm0 = vcmask 1040384  }
  0x4d   :  { %4894 = vst [vmem:[#allocation35_spill] sm:$0xff] %v3994_v43  ;;  %823 = vmatpush.bf16.msra.mxu1 %v3977_v47  ;;  %843 = vmatpush.bf16.msra.mxu2 %v3979_v30  ;;  %v3116_v13 = vld [vmem:[%s4817_s1 + $0x284] sm:$0xf]  ;;  %v2640_v2 = vld [vmem:[%s4817_s1 + $0x290] sm:$0xf0]  ;;  %v4030_v55 = vor.u32 %v3118_v51, %v2638_v39  ;;  %vm1734_vm1 = vcmask 1046528  }
  0x4e   :  { %4895 = vst [vmem:[#allocation36_spill] sm:$0xff] %v4004_v20  ;;  %v2630_v15 = vld [vmem:[%s4817_s1 + $0x268] sm:$0xf]  ;;  %v3115_v63 = vld [vmem:[%s4817_s1 + $0x274] sm:$0xf0]  ;;  %v4040_v37 = vor.u32 %v3116_v13, %v2640_v2  ;;  %s3265_s11 = smov 64  }
  0x4f   :  { %4896 = vst [vmem:[#allocation37_spill] sm:$0xff] %v4006_v1  ;;  %v3113_v30 = vld [vmem:[%s4817_s1 + $0x26c] sm:$0xf]  ;;  %v2632_v47 = vld [vmem:[%s4817_s1 + $0x278] sm:$0xf0]  ;;  %vm1800_vm2 = vcmask 1041409  }
  0x50   :  { %862 = vmatpush.bf16.msra.mxu3 %v3992_v28  ;;  %805 = vmatpush.bf16.msra.mxu0 %v3994_v43  ;;  %4897 = vst [vmem:[#allocation38_spill] sm:$0xff] %v4028_v24  ;;  %v4042_v28 = vor.u32 %v3115_v63, %v2630_v15  ;;  %v2622_v54 = vld [vmem:[%s4817_s1 + $0x260] sm:$0xf]  ;;  %v3114_v59 = vld [vmem:[%s4817_s1 + $0x26c] sm:$0xf0]  ;;  %v3029_v15 = vld [vmem:[%s4816_s0 + $0x8] sm:$0xff]  ;;  %v4067_v63 = vor.u32 %v3113_v30, %v2632_v47 }
  0x51   :  { %4898 = vst [vmem:[#allocation39_spill] sm:$0xff] %v4030_v55  ;;  %824 = vmatpush.bf16.msra.mxu1 %v4004_v20  ;;  %844 = vmatpush.bf16.msra.mxu2 %v4006_v1  ;;  %v3112_v39 = vld [vmem:[%s4817_s1 + $0x264] sm:$0xf]  ;;  %v2624_v51 = vld [vmem:[%s4817_s1 + $0x270] sm:$0xf0]  ;;  %v4069_v1 = vor.u32 %v3114_v59, %v2622_v54  ;;  %vm1840_vm3 = vcmask 523264  }
  0x52   :  { %4899 = vst [vmem:[#allocation40_spill] sm:$0xff] %v4040_v37  ;;  %v2614_v13 = vld [vmem:[%s4817_s1 + $0x248] sm:$0xf]  ;;  %v3111_v2 = vld [vmem:[%s4817_s1 + $0x254] sm:$0xf0]  ;;  %s3266_s26 = smov [#allocation2]  }
  0x53   :  { %4900 = vst [vmem:[#allocation41_spill] sm:$0xff] %v4042_v28  ;;  %v3109_v20 = vld [vmem:[%s4817_s1 + $0x24c] sm:$0xf]  ;;  %v2616_v43 = vld [vmem:[%s4817_s1 + $0x258] sm:$0xf0]  ;;  %s2207_s29 = sshll.u32 %s4820_s4, 4  ;;  %s2208_s29 = int_to_ptr.hbm [resolvable:$true] %s2207_s29 }
  0x54   :  { %863 = vmatpush.bf16.msra.mxu3 %v4028_v24  ;;  %806 = vmatpush.bf16.msra.mxu0 %v4030_v55  ;;  %4901 = vst [vmem:[#allocation42_spill] sm:$0xff] %v4067_v63  ;;  %v4079_v55 = vor.u32 %v3112_v39, %v2624_v51  ;;  %v4081_v24 = vor.u32 %v3111_v2, %v2614_v13  ;;  %v2606_v47 = vld [vmem:[%s4817_s1 + $0x240] sm:$0xf]  ;;  %v3110_v30 = vld [vmem:[%s4817_s1 + $0x24c] sm:$0xf0]  ;;  %vm2198_vm4 = vcmask 9216  }
  0x55   :  { %4902 = vst [vmem:[#allocation43_spill] sm:$0xff] %v4069_v1  ;;  %825 = vmatpush.bf16.msra.mxu1 %v4040_v37  ;;  %845 = vmatpush.bf16.msra.mxu2 %v4042_v28  ;;  %v3108_v54 = vld [vmem:[%s4817_s1 + $0x244] sm:$0xf]  ;;  %v2608_v59 = vld [vmem:[%s4817_s1 + $0x250] sm:$0xf0]  ;;  %v4103_v13 = vor.u32 %v3109_v20, %v2616_v43  ;;  %v4105_v2 = vor.u32 %v3110_v30, %v2606_v47 }
  0x56   :  { %4903 = vst [vmem:[#allocation44_spill] sm:$0xff] %v4079_v55  ;;  %v2598_v39 = vld [vmem:[%s4817_s1 + $0x228] sm:$0xf]  ;;  %v3107_v51 = vld [vmem:[%s4817_s1 + $0x234] sm:$0xf0]  ;;  %v4115_v40 = vor.u32 %v3108_v54, %v2608_v59 }
  0x57   :  { %4904 = vst [vmem:[#allocation45_spill] sm:$0xff] %v4081_v24  ;;  %v3105_v28 = vld [vmem:[%s4817_s1 + $0x22c] sm:$0xf]  ;;  %v2600_v37 = vld [vmem:[%s4817_s1 + $0x238] sm:$0xf0] }
  0x58   :  { %864 = vmatpush.bf16.msra.mxu3 %v4067_v63  ;;  %807 = vmatpush.bf16.msra.mxu0 %v4069_v1  ;;  %v4117_v63 = vor.u32 %v3107_v51, %v2598_v39  ;;  %v2590_v43 = vld [vmem:[%s4817_s1 + $0x220] sm:$0xf]  ;;  %v3106_v20 = vld [vmem:[%s4817_s1 + $0x22c] sm:$0xf0]  ;;  %v3104_v47 = vld [vmem:[%s4817_s1 + $0x224] sm:$0xf]  ;;  %v4139_v39 = vor.u32 %v3105_v28, %v2600_v37 }
  0x59   :  { %826 = vmatpush.bf16.msra.mxu1 %v4079_v55  ;;  %846 = vmatpush.bf16.msra.mxu2 %v4081_v24  ;;  %v2592_v30 = vld [vmem:[%s4817_s1 + $0x230] sm:$0xf0]  ;;  %v2582_v54 = vld [vmem:[%s4817_s1 + $0x208] sm:$0xf]  ;;  %v3103_v59 = vld [vmem:[%s4817_s1 + $0x214] sm:$0xf0]  ;;  %v4141_v51 = vor.u32 %v3106_v20, %v2590_v43 }
  0x5a   :  { %568 = vmatmul.bf16.gmra.mxu0 %v3029_v15  ;;  %606 = vmatmul.bf16.gmra.mxu2 %v3029_v15  ;;  %v3101_v24 = vld [vmem:[%s4817_s1 + $0x20c] sm:$0xf]  ;;  %v4148_v55 = vor.u32 %v3104_v47, %v2592_v30  ;;  %v4150_v1 = vor.u32 %v3103_v59, %v2582_v54  ;;  %v2574_v37 = vld [vmem:[%s4817_s1 + $0x200] sm:$0xf]  ;;  %v3102_v28 = vld [vmem:[%s4817_s1 + $0x20c] sm:$0xf0] }
  0x5b   :  { %587 = vmatmul.bf16.gmra.mxu1 %v3029_v15  ;;  %625 = vmatmul.bf16.gmra.mxu3 %v3029_v15  ;;  %v2584_v15 = vld [vmem:[%s4817_s1 + $0x218] sm:$0xf0]  ;;  %v3100_v43 = vld [vmem:[%s4817_s1 + $0x204] sm:$0xf]  ;;  %v2576_v20 = vld [vmem:[%s4817_s1 + $0x210] sm:$0xf0]  ;;  %v4171_v30 = vor.u32 %v3102_v28, %v2574_v37 }
  0x5c   :  { %865 = vmatpush.bf16.msra.mxu3 %v4103_v13  ;;  %808 = vmatpush.bf16.msra.mxu0 %v4105_v2  ;;  %v4169_v47 = vor.u32 %v3101_v24, %v2584_v15  ;;  %v4175_v54 = vor.u32 %v3100_v43, %v2576_v20  ;;  %v3030_v24 = vld [vmem:[%s4816_s0 + $0x10] sm:$0xff] }
  0x5d   :  { %827 = vmatpush.bf16.msra.mxu1 %v4115_v40  ;;  %847 = vmatpush.bf16.msra.mxu2 %v4117_v63  ;;  %v4943_v59 = vld [vmem:[#allocation44_spill] sm:$0xff]  ;;  %v4945_v20 = vld [vmem:[#allocation10_spill] sm:$0xff] }
  0x5e   :  { %v4944_v43 = vld [vmem:[#allocation45_spill] sm:$0xff] }
  0x60   :  { %866 = vmatpush.bf16.msra.mxu3 %v4139_v39  ;;  %809 = vmatpush.bf16.msra.mxu0 %v4141_v51 }
  0x61   :  { %828 = vmatpush.bf16.msra.mxu1 %v4148_v55  ;;  %848 = vmatpush.bf16.msra.mxu2 %v4150_v1 }
  0x64   :  { %867 = vmatpush.bf16.msra.mxu3 %v4169_v47  ;;  %810 = vmatpush.bf16.msra.mxu0 %v4171_v30 }
  0x65   :  { %949 = vmatpush.bf16.msrb.mxu2 %v3314_v8  ;;  %829 = vmatpush.bf16.msra.mxu1 %v4175_v54  ;;  %v4906_v8 = vld [vmem:[#allocation7_spill] sm:$0xff] }
  0x68   :  { %968 = vmatpush.bf16.msrb.mxu3 %v3326_v12  ;;  %911 = vmatpush.bf16.msrb.mxu0 %v3301_v3  ;;  %v3031_v3 = vld [vmem:[%s4816_s0 + $0x18] sm:$0xff] }
  0x69   :  { %930 = vmatpush.bf16.msrb.mxu1 %v3312_v7  ;;  %950 = vmatpush.bf16.msrb.mxu2 %v3353_v21  ;;  %v4905_v7 = vld [vmem:[#allocation6_spill] sm:$0xff]  ;;  %v4907_v12 = vld [vmem:[#allocation8_spill] sm:$0xff] }
  0x6a   :  { %811 = vmatmul.bf16.vlgmr.msra.gmra.mxu0 %v3030_v24  ;;  %849 = vmatmul.bf16.vlgmr.msra.gmra.mxu2 %v3030_v24  ;;  %v4910_v21 = vld [vmem:[#allocation12_spill] sm:$0xff] }
  0x6b   :  { %830 = vmatmul.bf16.vlgmr.msra.gmra.mxu1 %v3030_v24  ;;  %868 = vmatmul.bf16.vlgmr.msra.gmra.mxu3 %v3030_v24 }
  0x6c   :  { %969 = vmatpush.bf16.msrb.mxu3 %v3364_v25  ;;  %912 = vmatpush.bf16.msrb.mxu0 %v3339_v16  ;;  %v4908_v16 = vld [vmem:[#allocation9_spill] sm:$0xff] }
  0x6d   :  { %931 = vmatpush.bf16.msrb.mxu1 %v3341_v17  ;;  %951 = vmatpush.bf16.msrb.mxu2 %v3391_v34  ;;  %v4909_v17 = vld [vmem:[#allocation11_spill] sm:$0xff]  ;;  %v4911_v25 = vld [vmem:[#allocation13_spill] sm:$0xff]  ;;  %v4914_v34 = vld [vmem:[#allocation16_spill] sm:$0xff] }
  0x70   :  { %970 = vmatpush.bf16.msrb.mxu3 %v3403_v38  ;;  %913 = vmatpush.bf16.msrb.mxu0 %v3376_v29  ;;  %v4912_v29 = vld [vmem:[#allocation14_spill] sm:$0xff]  ;;  %v4915_v38 = vld [vmem:[#allocation17_spill] sm:$0xff] }
  0x71   :  { %932 = vmatpush.bf16.msrb.mxu1 %v3389_v33  ;;  %952 = vmatpush.bf16.msrb.mxu2 %v3427_v46  ;;  %v4913_v33 = vld [vmem:[#allocation15_spill] sm:$0xff]  ;;  %v4918_v46 = vld [vmem:[#allocation20_spill] sm:$0xff] }
  0x74   :  { %971 = vmatpush.bf16.msrb.mxu3 %v3439_v50  ;;  %914 = vmatpush.bf16.msrb.mxu0 %v3421_v44  ;;  %v4916_v44 = vld [vmem:[#allocation18_spill] sm:$0xff]  ;;  %v4919_v50 = vld [vmem:[#allocation21_spill] sm:$0xff] }
  0x75   :  { %933 = vmatpush.bf16.msrb.mxu1 %v3425_v45  ;;  %953 = vmatpush.bf16.msrb.mxu2 %v3463_v58  ;;  %v4917_v45 = vld [vmem:[#allocation19_spill] sm:$0xff]  ;;  %v4922_v58 = vld [vmem:[#allocation24_spill] sm:$0xff] }
  0x78   :  { %972 = vmatpush.bf16.msrb.mxu3 %v3475_v62  ;;  %915 = vmatpush.bf16.msrb.mxu0 %v3457_v56  ;;  %v4920_v56 = vld [vmem:[#allocation22_spill] sm:$0xff]  ;;  %v4923_v62 = vld [vmem:[#allocation25_spill] sm:$0xff] }
  0x79   :  { %934 = vmatpush.bf16.msrb.mxu1 %v3461_v57  ;;  %954 = vmatpush.bf16.msrb.mxu2 %v3499_v9  ;;  %v4921_v57 = vld [vmem:[#allocation23_spill] sm:$0xff]  ;;  %v4926_v9 = vld [vmem:[#allocation26_spill] sm:$0xff] }
  0x7a   :  { %816 = vmatmul.bf16.gmra.mxu0 %v3031_v3  ;;  %854 = vmatmul.bf16.gmra.mxu2 %v3031_v3 }
  0x7b   :  { %835 = vmatmul.bf16.gmra.mxu1 %v3031_v3  ;;  %873 = vmatmul.bf16.gmra.mxu3 %v3031_v3 }
  0x7c   :  { %973 = vmatpush.bf16.msrb.mxu3 %v3511_v14  ;;  %916 = vmatpush.bf16.msrb.mxu0 %v3493_v5  ;;  %v4924_v5 = vld [vmem:[#allocation28_spill] sm:$0xff]  ;;  %v4927_v14 = vld [vmem:[#allocation27_spill] sm:$0xff] }
  0x7d   :  { %935 = vmatpush.bf16.msrb.mxu1 %v3497_v6  ;;  %955 = vmatpush.bf16.msrb.mxu2 %v3538_v27  ;;  %v4925_v6 = vld [vmem:[#allocation29_spill] sm:$0xff] }
  0x80   :  { %974 = vmatpush.bf16.msrb.mxu3 %v3550_v32  ;;  %917 = vmatpush.bf16.msrb.mxu0 %v3529_v23  ;;  %v4929_v32 = vld [vmem:[#allocation31_spill] sm:$0xff] }
  0x81   :  { %936 = vmatpush.bf16.msrb.mxu1 %v3536_v26  ;;  %956 = vmatpush.bf16.msrb.mxu2 %v3583_v49  ;;  %v4928_v26 = vld [vmem:[#allocation30_spill] sm:$0xff]  ;;  %v4932_v49 = vld [vmem:[#allocation33_spill] sm:$0xff] }
  0x84   :  { %975 = vmatpush.bf16.msrb.mxu3 %v3591_v52  ;;  %918 = vmatpush.bf16.msrb.mxu0 %v3571_v42  ;;  %v4930_v42 = vld [vmem:[#allocation32_spill] sm:$0xff]  ;;  %v4933_v52 = vld [vmem:[#allocation34_spill] sm:$0xff] }
  0x85   :  { %1025 = vmatpush.bf16.msra.mxu2 %v3593_v53  ;;  %937 = vmatpush.bf16.msrb.mxu1 %v3581_v48  ;;  %v4931_v48 = vld [vmem:[#allocation5_spill] sm:$0xff] }
  0x88   :  { %1044 = vmatpush.bf16.msra.mxu3 %v3604_v60  ;;  %987 = vmatpush.bf16.msra.mxu0 %v3624_v4  ;;  %v4934_v60 = vld [vmem:[#allocation35_spill] sm:$0xff]  ;;  %v4935_v4 = vld [vmem:[#allocation36_spill] sm:$0xff] }
  0x89   :  { %1006 = vmatpush.bf16.msra.mxu1 %v3628_v10  ;;  %1026 = vmatpush.bf16.msra.mxu2 %v3630_v11 }
  0x8a   :  { %919 = vmatmul.bf16.vlgmr.msrb.gmra.mxu0 %v3030_v24  ;;  %957 = vmatmul.bf16.vlgmr.msrb.gmra.mxu2 %v3030_v24 }
  0x8b   :  { %938 = vmatmul.bf16.vlgmr.msrb.gmra.mxu1 %v3030_v24  ;;  %976 = vmatmul.bf16.vlgmr.msrb.gmra.mxu3 %v3030_v24 }
  0x8c   :  { %1045 = vmatpush.bf16.msra.mxu3 %v3643_v19  ;;  %988 = vmatpush.bf16.msra.mxu0 %v3664_v31  ;;  %v4936_v31 = vld [vmem:[#allocation37_spill] sm:$0xff] }
  0x8d   :  { %1007 = vmatpush.bf16.msra.mxu1 %v3668_v35  ;;  %1027 = vmatpush.bf16.msra.mxu2 %v3670_v36  ;;  %v4937_v35 = vld [vmem:[#allocation38_spill] sm:$0xff]  ;;  %v4938_v36 = vld [vmem:[#allocation39_spill] sm:$0xff] }
  0x90   :  { %1046 = vmatpush.bf16.msra.mxu3 %v3682_v41  ;;  %989 = vmatpush.bf16.msra.mxu0 %v3700_v61  ;;  %v4939_v41 = vld [vmem:[#allocation40_spill] sm:$0xff]  ;;  %v4940_v61 = vld [vmem:[#allocation41_spill] sm:$0xff] }
  0x91   :  { %1008 = vmatpush.bf16.msra.mxu1 %v4905_v7  ;;  %1028 = vmatpush.bf16.msra.mxu2 %v4906_v8 }
  0x94   :  { %1047 = vmatpush.bf16.msra.mxu3 %v4907_v12  ;;  %990 = vmatpush.bf16.msra.mxu0 %v4908_v16 }
  0x95   :  { %1009 = vmatpush.bf16.msra.mxu1 %v4909_v17  ;;  %1029 = vmatpush.bf16.msra.mxu2 %v4910_v21 }
  0x98   :  { %1048 = vmatpush.bf16.msra.mxu3 %v4911_v25  ;;  %991 = vmatpush.bf16.msra.mxu0 %v4912_v29  ;;  %v3035_v25 = vld [vmem:[%s4816_s0 + $0x38] sm:$0xff] }
  0x99   :  { %1010 = vmatpush.bf16.msra.mxu1 %v4913_v33  ;;  %1030 = vmatpush.bf16.msra.mxu2 %v4914_v34 }
  0x9a   :  { %924 = vmatmul.bf16.gmra.mxu0 %v3031_v3  ;;  %962 = vmatmul.bf16.gmra.mxu2 %v3031_v3 }
  0x9b   :  { %943 = vmatmul.bf16.gmra.mxu1 %v3031_v3  ;;  %981 = vmatmul.bf16.gmra.mxu3 %v3031_v3 }
  0x9c   :  { %1049 = vmatpush.bf16.msra.mxu3 %v4915_v38  ;;  %992 = vmatpush.bf16.msra.mxu0 %v4916_v44 }
  0x9d   :  { %1011 = vmatpush.bf16.msra.mxu1 %v4917_v45  ;;  %1031 = vmatpush.bf16.msra.mxu2 %v4918_v46 }
  0xa0   :  { %1050 = vmatpush.bf16.msra.mxu3 %v4919_v50  ;;  %993 = vmatpush.bf16.msra.mxu0 %v4920_v56  ;;  %v316_v23 = vpop.f32.mrf.mxu0 }
  0xa1   :  { %1012 = vmatpush.bf16.msra.mxu1 %v4921_v57  ;;  %1032 = vmatpush.bf16.msra.mxu2 %v4922_v58  ;;  %v335_v27 = vpop.f32.mrf.mxu1 }
  0xa4   :  { %1051 = vmatpush.bf16.msra.mxu3 %v4923_v62  ;;  %994 = vmatpush.bf16.msra.mxu0 %v4924_v5 }
  0xa5   :  { %1013 = vmatpush.bf16.msra.mxu1 %v4925_v6  ;;  %1113 = vmatpush.bf16.msrb.mxu2 %v4926_v9 }
  0xa7   :  { %v354_v53 = vpop.f32.mrf.mxu2 }
  0xa8   :  { %1132 = vmatpush.bf16.msrb.mxu3 %v4927_v14  ;;  %1075 = vmatpush.bf16.msrb.mxu0 %v3920_v22  ;;  %v373_v10 = vpop.f32.mrf.mxu3  ;;  %v4266_v11 = vpop.f32.mrf.mxu0  ;;  %v4941_v22 = vld [vmem:[#allocation42_spill] sm:$0xff] }
  0xa9   :  { %1094 = vmatpush.bf16.msrb.mxu1 %v3930_v0  ;;  %1114 = vmatpush.bf16.msrb.mxu2 %v3932_v18  ;;  %v4268_v19 = vpop.f32.mrf.mxu1  ;;  %v4942_v18 = vld [vmem:[#allocation43_spill] sm:$0xff] }
  0xaa   :  { %995 = vmatmul.bf16.vlgmr.msra.gmra.mxu0 %v4931_v48  ;;  %1033 = vmatmul.bf16.vlgmr.msra.gmra.mxu2 %v4931_v48 }
  0xab   :  { %1014 = vmatmul.bf16.vlgmr.msra.gmra.mxu1 %v4931_v48  ;;  %1052 = vmatmul.bf16.vlgmr.msra.gmra.mxu3 %v4931_v48 }
  0xac   :  { %1133 = vmatpush.bf16.msrb.mxu3 %v4928_v26  ;;  %1076 = vmatpush.bf16.msrb.mxu0 %v4929_v32 }
  0xad   :  { %1095 = vmatpush.bf16.msrb.mxu1 %v4930_v42  ;;  %1115 = vmatpush.bf16.msrb.mxu2 %v4932_v49 }
  0xaf   :  { %v4276_v0 = vpop.f32.mrf.mxu2 }
  0xb0   :  { %1134 = vmatpush.bf16.msrb.mxu3 %v4933_v52  ;;  %1077 = vmatpush.bf16.msrb.mxu0 %v4934_v60  ;;  %v4280_v15 = vpop.f32.mrf.mxu3  ;;  %v321_v37 = vpop.f32.mrf.mxu0 }
  0xb1   :  { %1096 = vmatpush.bf16.msrb.mxu1 %v4935_v4  ;;  %1116 = vmatpush.bf16.msrb.mxu2 %v4936_v31  ;;  %v340_v28 = vpop.f32.mrf.mxu1 }
  0xb4   :  { %1135 = vmatpush.bf16.msrb.mxu3 %v4937_v35  ;;  %1078 = vmatpush.bf16.msrb.mxu0 %v4938_v36 }
  0xb5   :  { %1097 = vmatpush.bf16.msrb.mxu1 %v4939_v41  ;;  %1117 = vmatpush.bf16.msrb.mxu2 %v4940_v61 }
  0xb7   :  { %v359_v24 = vpop.f32.mrf.mxu2 }
  0xb8   :  { %1136 = vmatpush.bf16.msrb.mxu3 %v4941_v22  ;;  %1079 = vmatpush.bf16.msrb.mxu0 %v4942_v18 }
  0xb9   :  { %1098 = vmatpush.bf16.msrb.mxu1 %v4943_v59  ;;  %1118 = vmatpush.bf16.msrb.mxu2 %v4944_v43 }
  0xba   :  { %1000 = vmatmul.bf16.gmra.mxu0 %v4945_v20  ;;  %1038 = vmatmul.bf16.gmra.mxu2 %v4945_v20 }
  0xbb   :  { %1019 = vmatmul.bf16.gmra.mxu1 %v4945_v20  ;;  %1057 = vmatmul.bf16.gmra.mxu3 %v4945_v20 }
  0xbc   :  { %1137 = vmatpush.bf16.msrb.mxu3 %v4103_v13  ;;  %1080 = vmatpush.bf16.msrb.mxu0 %v4105_v2  ;;  %v378_v13 = vpop.f32.mrf.mxu3  ;;  %v4294_v2 = vpop.f32.mrf.mxu0 }
  0xbd   :  { %1099 = vmatpush.bf16.msrb.mxu1 %v4115_v40  ;;  %1119 = vmatpush.bf16.msrb.mxu2 %v4117_v63  ;;  %v4296_v40 = vpop.f32.mrf.mxu1 }
  0xbf   :  { %v361_v63 = vpop.f32.mrf.mxu2 }
  0xc0   :  { %1138 = vmatpush.bf16.msrb.mxu3 %v4139_v39  ;;  %1081 = vmatpush.bf16.msrb.mxu0 %v4141_v51  ;;  %v3034_v51 = vld [vmem:[%s4816_s0 + $0x30] sm:$0xff] }
  0xc1   :  { %1100 = vmatpush.bf16.msrb.mxu1 %v4148_v55  ;;  %1120 = vmatpush.bf16.msrb.mxu2 %v4150_v1 }
  0xc4   :  { %1139 = vmatpush.bf16.msrb.mxu3 %v4169_v47  ;;  %1082 = vmatpush.bf16.msrb.mxu0 %v4171_v30  ;;  %v380_v39 = vpop.f32.mrf.mxu3 }
  0xc5   :  { %1101 = vmatpush.bf16.msrb.mxu1 %v4175_v54 }
  0xc7   :  { %v564_v55 = vpop.f32.mrf.mxu0 }
  0xc8   :  { %v565_v3 = vadd.f32 %v564_v55, %v316_v23  ;;  %v583_v7 = vpop.f32.mrf.mxu1 }
  0xc9   :  { %v584_v8 = vadd.f32 %v583_v7, %v335_v27 }
  0xca   :  { %1083 = vmatmul.bf16.vlgmr.msrb.gmra.mxu0 %v3034_v51  ;;  %1121 = vmatmul.bf16.vlgmr.msrb.gmra.mxu2 %v3034_v51 }
  0xcb   :  { %1102 = vmatmul.bf16.vlgmr.msrb.gmra.mxu1 %v3034_v51  ;;  %1140 = vmatmul.bf16.vlgmr.msrb.gmra.mxu3 %v3034_v51 }
  0xcd   :  { %v602_v1 = vpop.f32.mrf.mxu2 }
  0xce   :  { %v603_v47 = vadd.f32 %v602_v1, %v354_v53  ;;  %v621_v12 = vpop.f32.mrf.mxu3 }
  0xcf   :  { %v622_v30 = vadd.f32 %v621_v12, %v373_v10  ;;  %v4305_v16 = vpop.f32.mrf.mxu0 }
  0xd0   :  { %v4307_v54 = vpop.f32.mrf.mxu1 }
  0xd5   :  { %v4309_v17 = vpop.f32.mrf.mxu2 }
  0xd6   :  { %v4311_v21 = vpop.f32.mrf.mxu3 }
  0xd7   :  { %v569_v29 = vpop.f32.mrf.mxu0 }
  0xd8   :  { %v570_v33 = vadd.f32 %v569_v29, %v321_v37  ;;  %v588_v34 = vpop.f32.mrf.mxu1  ;;  %v3139_v29 = vld [vmem:[%s4818_s2 + $0x38] sm:$0xff] }
  0xd9   :  { %v589_v38 = vadd.f32 %v588_v34, %v340_v28  ;;  %v3155_v34 = vld [vmem:[%s4818_s2 + $0xb8] sm:$0xff]  ;;  %1339 = vmatpush.bf16.msra.mxu0 %v3139_v29 }
  0xda   :  { %1088 = vmatmul.bf16.gmra.mxu0 %v3035_v25  ;;  %1126 = vmatmul.bf16.gmra.mxu2 %v3035_v25 }
  0xdb   :  { %1107 = vmatmul.bf16.gmra.mxu1 %v3035_v25  ;;  %1145 = vmatmul.bf16.gmra.mxu3 %v3035_v25 }
  0xdc   :  { %1505 = vmatpush.bf16.msra.mxu2 %v3155_v34  ;;  %v3135_v34 = vld [vmem:[%s4818_s2 + $0x18] sm:$0xff] }
  0xdd   :  { %v607_v44 = vpop.f32.mrf.mxu2 }
  0xde   :  { %v626_v45 = vpop.f32.mrf.mxu3  ;;  %v608_v10 = vadd.f32 %v607_v44, %v359_v24  ;;  %v3138_v44 = vld [vmem:[%s4818_s2 + $0x30] sm:$0xff] }
  0xdf   :  { %v627_v46 = vadd.f32 %v626_v45, %v378_v13  ;;  %v4316_v50 = vpop.f32.mrf.mxu0  ;;  %v3146_v45 = vld [vmem:[%s4818_s2 + $0x70] sm:$0xff]  ;;  %1340 = vmatpush.bf16.msra.mxu0 %v3138_v44  ;;  %v3151_v44 = vld [vmem:[%s4818_s2 + $0x98] sm:$0xff] }
  0xe0   :  { %v4318_v56 = vpop.f32.mrf.mxu1 }
  0xe5   :  { %v609_v57 = vpop.f32.mrf.mxu2 }
  0xe6   :  { %v628_v58 = vpop.f32.mrf.mxu3  ;;  %v610_v18 = vadd.f32 %v609_v57, %v361_v63  ;;  %v3162_v57 = vld [vmem:[%s4818_s2 + $0xf0] sm:$0xff] }
  0xe7   :  { %v812_v62 = vpop.f32.mrf.mxu0  ;;  %v629_v59 = vadd.f32 %v628_v58, %v380_v39 }
  0xe8   :  { %v4320_v5 = vadd.f32 %v812_v62, %v565_v3  ;;  %v831_v6 = vpop.f32.mrf.mxu1 }
  0xe9   :  { %v4322_v9 = vadd.f32 %v831_v6, %v584_v8 }
  0xed   :  { %v850_v14 = vpop.f32.mrf.mxu2 }
  0xee   :  { %v4324_v23 = vadd.f32 %v850_v14, %v603_v47  ;;  %v869_v26 = vpop.f32.mrf.mxu3 }
  0xef   :  { %v4326_v27 = vadd.f32 %v869_v26, %v622_v30  ;;  %v4328_v32 = vpop.f32.mrf.mxu0  ;;  %v3137_v26 = vld [vmem:[%s4818_s2 + $0x28] sm:$0xff] }
  0xf0   :  { %v4330_v42 = vpop.f32.mrf.mxu1  ;;  %1341 = vmatpush.bf16.msra.mxu0 %v3137_v26  ;;  %v3150_v26 = vld [vmem:[%s4818_s2 + $0x90] sm:$0xff] }
  0xf5   :  { %v4332_v48 = vpop.f32.mrf.mxu2 }
  0xf6   :  { %v4334_v49 = vpop.f32.mrf.mxu3 }
  0xf7   :  { %v817_v52 = vpop.f32.mrf.mxu0 }
  0xf8   :  { %v4336_v53 = vadd.f32 %v817_v52, %v570_v33  ;;  %v836_v60 = vpop.f32.mrf.mxu1  ;;  %v3147_v33 = vld [vmem:[%s4818_s2 + $0x78] sm:$0xff]  ;;  %v3145_v52 = vld [vmem:[%s4818_s2 + $0x68] sm:$0xff] }
  0xf9   :  { %v4338_v4 = vadd.f32 %v836_v60, %v589_v38  ;;  %v3163_v38 = vld [vmem:[%s4818_s2 + $0xf8] sm:$0xff]  ;;  %1358 = vmatpush.bf16.msra.mxu1 %v3147_v33  ;;  %v3153_v60 = vld [vmem:[%s4818_s2 + $0xa8] sm:$0xff] }
  0xfa   :  { %1524 = vmatpush.bf16.msra.mxu3 %v3163_v38  ;;  %v3143_v38 = vld [vmem:[%s4818_s2 + $0x58] sm:$0xff] }
  0xfd   :  { %v855_v31 = vpop.f32.mrf.mxu2  ;;  %1359 = vmatpush.bf16.msra.mxu1 %v3146_v45  ;;  %v3159_v45 = vld [vmem:[%s4818_s2 + $0xd8] sm:$0xff] }
  0xfe   :  { %v4340_v35 = vadd.f32 %v855_v31, %v608_v10  ;;  %v874_v36 = vpop.f32.mrf.mxu3  ;;  %1525 = vmatpush.bf16.msra.mxu3 %v3162_v57  ;;  %v3161_v10 = vld [vmem:[%s4818_s2 + $0xe8] sm:$0xff]  ;;  %v3136_v31 = vld [vmem:[%s4818_s2 + $0x20] sm:$0xff]  ;;  %v3142_v57 = vld [vmem:[%s4818_s2 + $0x50] sm:$0xff] }
  0xff   :  { %v4342_v41 = vadd.f32 %v874_v36, %v627_v46  ;;  %v4344_v61 = vpop.f32.mrf.mxu0  ;;  %v3154_v46 = vld [vmem:[%s4818_s2 + $0xb0] sm:$0xff]  ;;  %v3144_v36 = vld [vmem:[%s4818_s2 + $0x60] sm:$0xff]  ;;  %1342 = vmatpush.bf16.msra.mxu0 %v3136_v31 }
 0x100   :  { %v4346_v22 = vpop.f32.mrf.mxu1  ;;  %1506 = vmatpush.bf16.msra.mxu2 %v3154_v46  ;;  %v3134_v46 = vld [vmem:[%s4818_s2 + $0x10] sm:$0xff] }
 0x101   :  { %4946 = vst [vmem:[#allocation6_spill] sm:$0xff] %v4346_v22  ;;  %1360 = vmatpush.bf16.msra.mxu1 %v3145_v52  ;;  %v3169_v22 = vld [vmem:[%s4818_s2 + $0x128] sm:$0xff] }
 0x102   :  { %1526 = vmatpush.bf16.msra.mxu3 %v3161_v10 }
 0x103   :  { %1343 = vmatpush.bf16.msra.mxu0 %v3135_v34  ;;  %v3149_v34 = vld [vmem:[%s4818_s2 + $0x88] sm:$0xff] }
 0x104   :  { %1507 = vmatpush.bf16.msra.mxu2 %v3153_v60  ;;  %v3158_v60 = vld [vmem:[%s4818_s2 + $0xd0] sm:$0xff] }
 0x105   :  { %v857_v37 = vpop.f32.mrf.mxu2  ;;  %1361 = vmatpush.bf16.msra.mxu1 %v3144_v36 }
 0x106   :  { %v4348_v28 = vadd.f32 %v857_v37, %v610_v18  ;;  %v876_v43 = vpop.f32.mrf.mxu3  ;;  %v3152_v18 = vld [vmem:[%s4818_s2 + $0xa0] sm:$0xff] }
 0x107   :  { %v4350_v20 = vadd.f32 %v876_v43, %v629_v59  ;;  %v4352_v13 = vpop.f32.mrf.mxu0  ;;  %v3160_v37 = vld [vmem:[%s4818_s2 + $0xe0] sm:$0xff]  ;;  %1344 = vmatpush.bf16.msra.mxu0 %v3134_v46 }
 0x108   :  { %4947 = vst [vmem:[#allocation7_spill] sm:$0xff] %v4348_v28  ;;  %v4354_v24 = vpop.f32.mrf.mxu1  ;;  %1508 = vmatpush.bf16.msra.mxu2 %v3152_v18  ;;  %1527 = vmatpush.bf16.msra.mxu3 %v3160_v37  ;;  %v3133_v18 = vld [vmem:[%s4818_s2 + $0x8] sm:$0xff]  ;;  %v3148_v46 = vld [vmem:[%s4818_s2 + $0x80] sm:$0xff] }
 0x109   :  { %4948 = vst [vmem:[#allocation8_spill] sm:$0xff] %v4350_v20  ;;  %1362 = vmatpush.bf16.msra.mxu1 %v3143_v38  ;;  %v3141_v37 = vld [vmem:[%s4818_s2 + $0x48] sm:$0xff] }
 0x10a   :  { %v3157_v38 = vld [vmem:[%s4818_s2 + $0xc8] sm:$0xff] }
 0x10b   :  { %1345 = vmatpush.bf16.msra.mxu0 %v3133_v18 }
 0x10c   :  { %1509 = vmatpush.bf16.msra.mxu2 %v3151_v44  ;;  %1528 = vmatpush.bf16.msra.mxu3 %v3159_v45  ;;  %v3132_v44 = vld [vmem:[%s4818_s2] sm:$0xff] }
 0x10d   :  { %v4356_v51 = vpop.f32.mrf.mxu2  ;;  %1363 = vmatpush.bf16.msra.mxu1 %v3142_v57  ;;  %v3140_v45 = vld [vmem:[%s4818_s2 + $0x40] sm:$0xff] }
 0x10e   :  { %v4358_v55 = vpop.f32.mrf.mxu3 }
 0x10f   :  { %v4360_v3 = vpop.f32.mrf.mxu0  ;;  %1346 = vmatpush.bf16.msra.mxu0 %v3132_v44  ;;  %v3170_v44 = vld [vmem:[%s4818_s2 + $0x130] sm:$0xff] }
 0x110   :  { %v4362_v7 = vpop.f32.mrf.mxu1  ;;  %1510 = vmatpush.bf16.msra.mxu2 %v3150_v26  ;;  %1529 = vmatpush.bf16.msra.mxu3 %v3158_v60  ;;  %v3156_v26 = vld [vmem:[%s4818_s2 + $0xc0] sm:$0xff] }
 0x111   :  { %1364 = vmatpush.bf16.msra.mxu1 %v3141_v37 }
 0x114   :  { %1511 = vmatpush.bf16.msra.mxu2 %v3149_v34  ;;  %1530 = vmatpush.bf16.msra.mxu3 %v3157_v38  ;;  %v3171_v34 = vld [vmem:[%s4818_s2 + $0x138] sm:$0xff] }
 0x115   :  { %v4364_v63 = vpop.f32.mrf.mxu2  ;;  %1365 = vmatpush.bf16.msra.mxu1 %v3140_v45  ;;  %v3179_v38 = vld [vmem:[%s4818_s2 + $0x178] sm:$0xff]  ;;  %1671 = vmatpush.bf16.msrb.mxu0 %v3171_v34  ;;  %v3178_v45 = vld [vmem:[%s4818_s2 + $0x170] sm:$0xff] }
 0x116   :  { %v4366_v39 = vpop.f32.mrf.mxu3 }
 0x117   :  { %v4368_v8 = vpop.f32.mrf.mxu0 }
 0x118   :  { %v4370_v1 = vpop.f32.mrf.mxu1  ;;  %1512 = vmatpush.bf16.msra.mxu2 %v3148_v46  ;;  %1531 = vmatpush.bf16.msra.mxu3 %v3156_v26 }
 0x119   :  { %1690 = vmatpush.bf16.msrb.mxu1 %v3179_v38  ;;  %1672 = vmatpush.bf16.msrb.mxu0 %v3170_v44  ;;  %v896_v44 = vmax.f32 %v4322_v9, 0.0 }
 0x11d   :  { %v4372_v47 = vpop.f32.mrf.mxu2  ;;  %1691 = vmatpush.bf16.msrb.mxu1 %v3178_v45  ;;  %1673 = vmatpush.bf16.msrb.mxu0 %v3169_v22 }
 0x11e   :  { %v4374_v12 = vpop.f32.mrf.mxu3 }
 0x11f   :  { %v4376_v30 = vpop.f32.mrf.mxu0 }
 0x120   :  { %v4378_v25 = vpop.f32.mrf.mxu1 }
 0x125   :  { %v4404_v58 = vpop.f32.mrf.mxu2 }
 0x126   :  { %4949 = vst [vmem:[#allocation9_spill] sm:$0xff] %v4404_v58  ;;  %v4406_v62 = vpop.f32.mrf.mxu3 }
 0x127   :  { %4950 = vst [vmem:[#allocation11_spill] sm:$0xff] %v4406_v62  ;;  %v4408_v6 = vpop.f32.mrf.mxu0 }
 0x128   :  { %v4410_v14 = vpop.f32.mrf.mxu1  ;;  %v997_v26 = vadd.f32 %v4408_v6, %v4352_v13  ;;  %v895_v13 = vmax.f32 %v4320_v5, 0.0 }
 0x129   :  { %v1016_v34 = vadd.f32 %v4410_v14, %v4354_v24 }
 0x12d   :  { %v4433_v59 = vpop.f32.mrf.mxu2 }
 0x12e   :  { %v4438_v43 = vpop.f32.mrf.mxu3  ;;  %v1035_v14 = vadd.f32 %v4433_v59, %v4356_v51 }
 0x12f   :  { %v4440_v29 = vpop.f32.mrf.mxu0  ;;  %v1054_v5 = vadd.f32 %v4438_v43, %v4358_v55  ;;  %v3167_v55 = vld [vmem:[%s4818_s2 + $0x118] sm:$0xff] }
 0x130   :  { %v4442_v33 = vpop.f32.mrf.mxu1  ;;  %v3175_v43 = vld [vmem:[%s4818_s2 + $0x158] sm:$0xff] }
 0x135   :  { %v4465_v52 = vpop.f32.mrf.mxu2 }
 0x136   :  { %v4470_v10 = vpop.f32.mrf.mxu3 }
 0x137   :  { %v4472_v31 = vpop.f32.mrf.mxu0 }
 0x138   :  { %v4474_v36 = vpop.f32.mrf.mxu1 }
 0x13d   :  { %v4497_v57 = vpop.f32.mrf.mxu2 }
 0x13e   :  { %v4502_v60 = vpop.f32.mrf.mxu3 }
 0x13f   :  { %v4504_v18 = vpop.f32.mrf.mxu0 }
 0x140   :  { %v4506_v37 = vpop.f32.mrf.mxu1 }
 0x145   :  { %v4520_v46 = vpop.f32.mrf.mxu2 }
 0x146   :  { %4951 = vst [vmem:[#allocation12_spill] sm:$0xff] %v4520_v46  ;;  %v4524_v20 = vpop.f32.mrf.mxu3  ;;  %v3177_v46 = vld [vmem:[%s4818_s2 + $0x168] sm:$0xff] }
 0x147   :  { %v1084_v38 = vpop.f32.mrf.mxu0  ;;  %1692 = vmatpush.bf16.msrb.mxu1 %v3177_v46  ;;  %v897_v46 = vmax.f32 %v4324_v23, 0.0  ;;  %v1018_v23 = vadd.f32 %v4442_v33, %v4362_v7 }
 0x148   :  { %v1151_v28 = vadd.f32 %v1084_v38, %v997_v26  ;;  %v1103_v62 = vpop.f32.mrf.mxu1  ;;  %v3168_v26 = vld [vmem:[%s4818_s2 + $0x120] sm:$0xff] }
 0x149   :  { %v1152_v58 = vadd.f32 %v1103_v62, %v1016_v34  ;;  %v3176_v62 = vld [vmem:[%s4818_s2 + $0x160] sm:$0xff]  ;;  %1674 = vmatpush.bf16.msrb.mxu0 %v3168_v26  ;;  %v999_v34 = vadd.f32 %v4440_v29, %v4360_v3  ;;  %v605_v3 = vadd.f32 %v4309_v17, %v4276_v0  ;;  %v3166_v26 = vld [vmem:[%s4818_s2 + $0x110] sm:$0xff] }
 0x14a   :  { %v1167_v6 = vmax.f32 %v1151_v28, 0.0 }
 0x14b   :  { %v1168_v24 = vmax.f32 %v1152_v58, 0.0  ;;  %1693 = vmatpush.bf16.msrb.mxu1 %v3176_v62  ;;  %v885_v33 = vadd.f32 %v4332_v48, %v605_v3  ;;  %v1037_v62 = vadd.f32 %v4465_v52, %v4364_v63  ;;  %v1021_v63 = vadd.f32 %v4474_v36, %v4370_v1  ;;  %v3164_v1 = vld [vmem:[%s4818_s2 + $0x100] sm:$0xff] }
 0x14c   :  { %v4538_v45 = vmax.f32 %v895_v13, %v1167_v6  ;;  %v567_v6 = vadd.f32 %v4305_v16, %v4266_v11  ;;  %v3174_v11 = vld [vmem:[%s4818_s2 + $0x150] sm:$0xff]  ;;  %v586_v16 = vadd.f32 %v4307_v54, %v4268_v19  ;;  %v1056_v19 = vadd.f32 %v4470_v10, %v4366_v39  ;;  %v3172_v36 = vld [vmem:[%s4818_s2 + $0x140] sm:$0xff] }
 0x14d   :  { %v4548_v22 = vmax.f32 %v896_v44, %v1168_v24  ;;  %v1122_v9 = vpop.f32.mrf.mxu2  ;;  %v898_v44 = vmax.f32 %v4326_v27, 0.0  ;;  %1675 = vmatpush.bf16.msrb.mxu0 %v3167_v55  ;;  %v624_v27 = vadd.f32 %v4311_v21, %v4280_v15  ;;  %v1002_v21 = vadd.f32 %v4472_v31, %v4368_v8 }
 0x14e   :  { %v1153_v28 = vadd.f32 %v1122_v9, %v1035_v14  ;;  %v1141_v58 = vpop.f32.mrf.mxu3  ;;  %v883_v17 = vadd.f32 %v4328_v32, %v567_v6  ;;  %v884_v9 = vadd.f32 %v4330_v42, %v586_v16  ;;  %v3165_v42 = vld [vmem:[%s4818_s2 + $0x108] sm:$0xff]  ;;  %v901_v31 = vmax.f32 %v885_v33, 0.0 }
 0x14f   :  { %v1154_v51 = vadd.f32 %v1141_v58, %v1054_v5  ;;  %v1086_v59 = vpop.f32.mrf.mxu0  ;;  %1694 = vmatpush.bf16.msrb.mxu1 %v3175_v43 }
 0x150   :  { %v1169_v38 = vmax.f32 %v1153_v28, 0.0  ;;  %v1105_v13 = vpop.f32.mrf.mxu1  ;;  %v1155_v14 = vadd.f32 %v1086_v59, %v999_v34  ;;  %v886_v28 = vadd.f32 %v4334_v49, %v624_v27  ;;  %v3173_v49 = vld [vmem:[%s4818_s2 + $0x148] sm:$0xff]  ;;  %v899_v8 = vmax.f32 %v883_v17, 0.0 }
 0x151   :  { %v1170_v24 = vmax.f32 %v1154_v51, 0.0  ;;  %v1156_v0 = vadd.f32 %v1105_v13, %v1018_v23  ;;  %1676 = vmatpush.bf16.msrb.mxu0 %v3166_v26  ;;  %v900_v59 = vmax.f32 %v884_v9, 0.0  ;;  %v903_v13 = vmax.f32 %v4336_v53, 0.0 }
 0x152   :  { %v1185_v29 = vmax.f32 %v897_v46, %v1169_v38  ;;  %v1171_v32 = vmax.f32 %v1155_v14, 0.0  ;;  %v902_v46 = vmax.f32 %v886_v28, 0.0  ;;  %v1040_v53 = vadd.f32 %v4497_v57, %v4372_v47 }
 0x153   :  { %v1186_v7 = vmax.f32 %v898_v44, %v1170_v24  ;;  %1695 = vmatpush.bf16.msrb.mxu1 %v3174_v11  ;;  %v1172_v39 = vmax.f32 %v1156_v0, 0.0  ;;  %v904_v44 = vmax.f32 %v4338_v4, 0.0  ;;  %v1059_v26 = vadd.f32 %v4502_v60, %v4374_v12 }
 0x154   :  { %v1199_v5 = vmax.f32 %v4538_v45, %v1185_v29  ;;  %v1187_v55 = vmax.f32 %v899_v8, %v1171_v32  ;;  %v905_v9 = vmax.f32 %v4340_v35, 0.0  ;;  %v1004_v47 = vadd.f32 %v4504_v18, %v4376_v30  ;;  %v4952_v32 = vld [vmem:[#allocation9_spill] sm:$0xff]  ;;  %v4956_v8 = vld [vmem:[#allocation7_spill] sm:$0xff] }
 0x155   :  { %v1200_v15 = vmax.f32 %v4548_v22, %v1186_v7  ;;  %v1124_v54 = vpop.f32.mrf.mxu2  ;;  %1677 = vmatpush.bf16.msrb.mxu0 %v3165_v42  ;;  %v1188_v23 = vmax.f32 %v900_v59, %v1172_v39  ;;  %v906_v12 = vmax.f32 %v4342_v41, 0.0  ;;  %v1023_v60 = vadd.f32 %v4506_v37, %v4378_v25  ;;  %v4953_v41 = vld [vmem:[#allocation12_spill] sm:$0xff]  ;;  %v4954_v25 = vld [vmem:[#allocation6_spill] sm:$0xff]  ;;  %v4955_v42 = vld [vmem:[#allocation11_spill] sm:$0xff] }
 0x156   :  { %v1157_v48 = vadd.f32 %v1124_v54, %v1037_v62  ;;  %v1143_v58 = vpop.f32.mrf.mxu3  ;;  %v591_v30 = vadd.f32 %v4318_v56, %v4296_v40 }
 0x157   :  { %v1158_v52 = vadd.f32 %v1143_v58, %v1056_v19  ;;  %v1089_v10 = vpop.f32.mrf.mxu0  ;;  %1696 = vmatpush.bf16.msrb.mxu1 %v3173_v49  ;;  %v572_v19 = vadd.f32 %v4316_v50, %v4294_v2  ;;  %v1061_v49 = vadd.f32 %v4524_v20, %v4955_v42 }
 0x158   :  { %v1173_v45 = vmax.f32 %v1157_v48, 0.0  ;;  %v1159_v22 = vadd.f32 %v1089_v10, %v1002_v21  ;;  %v1108_v51 = vpop.f32.mrf.mxu1  ;;  %v1042_v48 = vadd.f32 %v4953_v41, %v4952_v32  ;;  %v892_v37 = vadd.f32 %v4954_v25, %v591_v30 }
 0x159   :  { %v1174_v34 = vmax.f32 %v1158_v52, 0.0  ;;  %v1160_v38 = vadd.f32 %v1108_v51, %v1021_v63  ;;  %1678 = vmatpush.bf16.msrb.mxu0 %v3164_v1  ;;  %v891_v21 = vadd.f32 %v4344_v61, %v572_v19 }
 0x15a   :  { %v1189_v43 = vmax.f32 %v901_v31, %v1173_v45  ;;  %v1175_v6 = vmax.f32 %v1159_v22, 0.0  ;;  %v909_v31 = vmax.f32 %v4956_v8, 0.0  ;;  %v908_v45 = vmax.f32 %v892_v37, 0.0  ;;  %v4957_v22 = vld [vmem:[#allocation8_spill] sm:$0xff] }
 0x15b   :  { %v1190_v24 = vmax.f32 %v902_v46, %v1174_v34  ;;  %v1176_v3 = vmax.f32 %v1160_v38, 0.0  ;;  %1697 = vmatpush.bf16.msrb.mxu1 %v3172_v36  ;;  %v907_v56 = vmax.f32 %v891_v21, 0.0  ;;  %v910_v51 = vmax.f32 %v4957_v22, 0.0  ;;  %v3234_v37 = vld [vmem:[%s4819_s3] ss:$0 sm:$0xff] }
 0x15c   :  { %v1201_v29 = vmax.f32 %v1187_v55, %v1189_v43  ;;  %v1191_v14 = vmax.f32 %v903_v13, %v1175_v6 }
 0x15d   :  { %v1202_v11 = vmax.f32 %v1188_v23, %v1190_v24  ;;  %v1192_v16 = vmax.f32 %v904_v44, %v1176_v3  ;;  %v1127_v27 = vpop.f32.mrf.mxu2 }
 0x15e   :  { %v1207_v7 = vpack.c.bf16 %v1201_v29, %v1199_v5  ;;  %v1161_v0 = vadd.f32 %v1127_v27, %v1040_v53  ;;  %v1146_v17 = vpop.f32.mrf.mxu3 }
 0x15f   :  { %v1208_v4 = vpack.c.bf16 %v1202_v11, %v1200_v15  ;;  %v1162_v33 = vadd.f32 %v1146_v17, %v1059_v26  ;;  %v1091_v62 = vpop.f32.mrf.mxu0 }
 0x160   :  { %v1177_v57 = vmax.f32 %v1161_v0, 0.0  ;;  %v1110_v28 = vpop.f32.mrf.mxu1  ;;  %1347 = vmatmul.bf16.vlgmr.msra.gmra.mxu0 %v1207_v7  ;;  %1513 = vmatmul.bf16.vlgmr.msra.gmra.mxu2 %v1207_v7  ;;  %v1163_v35 = vadd.f32 %v1091_v62, %v1004_v47 }
 0x161   :  { %v1178_v5 = vmax.f32 %v1162_v33, 0.0  ;;  %1366 = vmatmul.bf16.vlgmr.msra.gmra.mxu1 %v1208_v4  ;;  %1532 = vmatmul.bf16.vlgmr.msra.gmra.mxu3 %v1208_v4  ;;  %v1164_v54 = vadd.f32 %v1110_v28, %v1023_v60 }
 0x162   :  { %v1193_v15 = vmax.f32 %v905_v9, %v1177_v57  ;;  %v1179_v50 = vmax.f32 %v1163_v35, 0.0 }
 0x163   :  { %v1194_v18 = vmax.f32 %v906_v12, %v1178_v5  ;;  %v1180_v10 = vmax.f32 %v1164_v54, 0.0 }
 0x164   :  { %v1203_v58 = vmax.f32 %v1191_v14, %v1193_v15  ;;  %v1195_v46 = vmax.f32 %v907_v56, %v1179_v50 }
 0x165   :  { %v1204_v63 = vmax.f32 %v1192_v16, %v1194_v18  ;;  %v1129_v2 = vpop.f32.mrf.mxu2  ;;  %v1196_v38 = vmax.f32 %v908_v45, %v1180_v10 }
 0x166   :  { %v1165_v39 = vadd.f32 %v1129_v2, %v1042_v48  ;;  %v1148_v52 = vpop.f32.mrf.mxu3 }
 0x167   :  { %v1166_v40 = vadd.f32 %v1148_v52, %v1061_v49 }
 0x168   :  { %v1181_v61 = vmax.f32 %v1165_v39, 0.0 }
 0x169   :  { %v1182_v59 = vmax.f32 %v1166_v40, 0.0 }
 0x16a   :  { %v1197_v34 = vmax.f32 %v909_v31, %v1181_v61 }
 0x16b   :  { %v1198_v13 = vmax.f32 %v910_v51, %v1182_v59 }
 0x16c   :  { %v1205_v20 = vmax.f32 %v1195_v46, %v1197_v34 }
 0x16d   :  { %v1206_v55 = vmax.f32 %v1196_v38, %v1198_v13 }
 0x16e   :  { %v1209_v43 = vpack.c.bf16 %v1205_v20, %v1203_v58 }
 0x16f   :  { %v1210_v6 = vpack.c.bf16 %v1206_v55, %v1204_v63 }
 0x170   :  { %1352 = vmatmul.bf16.gmra.mxu0 %v1209_v43  ;;  %1518 = vmatmul.bf16.gmra.mxu2 %v1209_v43 }
 0x171   :  { %1371 = vmatmul.bf16.gmra.mxu1 %v1210_v6  ;;  %1537 = vmatmul.bf16.gmra.mxu3 %v1210_v6 }
 0x180   :  { %1679 = vmatmul.bf16.vlgmr.msrb.gmra.mxu0 %v1207_v7 }
 0x181   :  { %1698 = vmatmul.bf16.vlgmr.msrb.gmra.mxu1 %v1208_v4 }
 0x190   :  { %1684 = vmatmul.bf16.gmra.mxu0 %v1209_v43 }
 0x191   :  { %1703 = vmatmul.bf16.gmra.mxu1 %v1210_v6 }
 0x1dd   :  { %v1348_v1 = vpop.f32.mrf.mxu0 }
 0x1de   :  { %v1367_v36 = vpop.f32.mrf.mxu1 }
 0x1df   :  { %v1368_v7 = vadd.f32 %v1367_v36, %v1348_v1 }
 0x1e1   :  { %v1714_v57 = vrot.slane %v1368_v7, 7  ;;  %v3195_v7 = vld [vmem:[%s4818_s2 + $0x1f8] sm:$0xff] }
 0x1e2   :  { %2120 = vmatpush.bf16.msrb.mxu3 %v3195_v7  ;;  %v3204_v7 = vld [vmem:[%s4818_s2 + $0x240] sm:$0xff] }
 0x1e3   :  { %v1514_v53 = vpop.f32.mrf.mxu2  ;;  %v1724_v30 = vsel %vm1713_vm0, 0.0, %v1714_v57 }
 0x1e4   :  { %v1533_v29 = vpop.f32.mrf.mxu3 }
 0x1e5   :  { %v1350_v44 = vpop.f32.mrf.mxu0  ;;  %v1534_v60 = vadd.f32 %v1533_v29, %v1514_v53 }
 0x1e6   :  { %v1369_v23 = vpop.f32.mrf.mxu1 }
 0x1e7   :  { %v1370_v15 = vadd.f32 %v1369_v23, %v1350_v44  ;;  %v1726_v21 = vadd.f32 %v1724_v30, %v1534_v60  ;;  %v3193_v60 = vld [vmem:[%s4818_s2 + $0x1e8] sm:$0xff]  ;;  %v3200_v30 = vld [vmem:[%s4818_s2 + $0x220] sm:$0xff] }
 0x1e9   :  { %v1715_v48 = vrot.slane %v1370_v15, 7  ;;  %v3184_v15 = vld [vmem:[%s4818_s2 + $0x1a0] sm:$0xff] }
 0x1eb   :  { %v1516_v27 = vpop.f32.mrf.mxu2  ;;  %v1716_v40 = vsel %vm1713_vm0, %v1714_v57, %v1715_v48  ;;  %v3202_v57 = vld [vmem:[%s4818_s2 + $0x230] sm:$0xff]  ;;  %v3191_v48 = vld [vmem:[%s4818_s2 + $0x1d8] sm:$0xff] }
 0x1ec   :  { %v1535_v0 = vpop.f32.mrf.mxu3 }
 0x1ed   :  { %v1353_v24 = vpop.f32.mrf.mxu0  ;;  %v1536_v2 = vadd.f32 %v1535_v0, %v1516_v27 }
 0x1ee   :  { %v1372_v3 = vpop.f32.mrf.mxu1 }
 0x1ef   :  { %v1373_v35 = vadd.f32 %v1372_v3, %v1353_v24  ;;  %v1727_v51 = vadd.f32 %v1716_v40, %v1536_v2 }
 0x1f1   :  { %v1717_v58 = vrot.slane %v1373_v35, 7  ;;  %v3192_v35 = vld [vmem:[%s4818_s2 + $0x1e0] sm:$0xff] }
 0x1f3   :  { %v1519_v4 = vpop.f32.mrf.mxu2  ;;  %v1725_v56 = vsel %vm1713_vm0, 0.0, %v1717_v58 }
 0x1f4   :  { %v1538_v62 = vpop.f32.mrf.mxu3 }
 0x1f5   :  { %v1355_v14 = vpop.f32.mrf.mxu0  ;;  %v1539_v50 = vadd.f32 %v1538_v62, %v1519_v4  ;;  %v3186_v4 = vld [vmem:[%s4818_s2 + $0x1b0] sm:$0xff] }
 0x1f6   :  { %v1374_v26 = vpop.f32.mrf.mxu1  ;;  %v3194_v62 = vld [vmem:[%s4818_s2 + $0x1f0] sm:$0xff] }
 0x1f7   :  { %v1375_v18 = vadd.f32 %v1374_v26, %v1355_v14  ;;  %v1728_v59 = vadd.f32 %v1725_v56, %v1539_v50  ;;  %2121 = vmatpush.bf16.msrb.mxu3 %v3194_v62  ;;  %v2174_v62 = vld [vmem:[%s4819_s3 + $0x78] sm:$0xff] }
 0x1f9   :  { %v1718_v42 = vrot.slane %v1375_v18, 7  ;;  %v3208_v18 = vld [vmem:[%s4818_s2 + $0x260] sm:$0xff] }
 0x1fb   :  { %v1521_v32 = vpop.f32.mrf.mxu2  ;;  %v1719_v31 = vsel %vm1713_vm0, %v1717_v58, %v1718_v42  ;;  %2122 = vmatpush.bf16.msrb.mxu3 %v3193_v60  ;;  %v3207_v42 = vld [vmem:[%s4818_s2 + $0x258] sm:$0xff]  ;;  %v2168_v60 = vld [vmem:[%s4819_s3 + $0x48] sm:$0xff] }
 0x1fc   :  { %v1540_v41 = vpop.f32.mrf.mxu3 }
 0x1fd   :  { %v1680_v11 = vpop.f32.mrf.mxu0  ;;  %v1541_v39 = vadd.f32 %v1540_v41, %v1521_v32  ;;  %v3183_v41 = vld [vmem:[%s4818_s2 + $0x198] sm:$0xff] }
 0x1fe   :  { %v1699_v16 = vpop.f32.mrf.mxu1 }
 0x1ff   :  { %v1700_v47 = vadd.f32 %v1699_v16, %v1680_v11  ;;  %v1729_v46 = vadd.f32 %v1719_v31, %v1541_v39  ;;  %2123 = vmatpush.bf16.msrb.mxu3 %v3192_v35  ;;  %v3182_v39 = vld [vmem:[%s4818_s2 + $0x190] sm:$0xff] }
 0x201   :  { %v1735_v19 = vrot.slane %v1700_v47, 1  ;;  %v3211_v47 = vld [vmem:[%s4818_s2 + $0x278] sm:$0xff] }
 0x202   :  { %2146 = vmatpush.bf16.msra.mxu1 %v3211_v47  ;;  %v2172_v47 = vld [vmem:[%s4819_s3 + $0x68] sm:$0xff] }
 0x203   :  { %2124 = vmatpush.bf16.msrb.mxu3 %v3191_v48 }
 0x205   :  { %v1682_v17 = vpop.f32.mrf.mxu0 }
 0x206   :  { %v1701_v33 = vpop.f32.mrf.mxu1 }
 0x207   :  { %v1702_v9 = vadd.f32 %v1701_v33, %v1682_v17  ;;  %v3187_v33 = vld [vmem:[%s4818_s2 + $0x1b8] sm:$0xff] }
 0x208   :  { %2107 = vmatpush.bf16.msrb.mxu2 %v3187_v33  ;;  %v3196_v33 = vld [vmem:[%s4818_s2 + $0x200] sm:$0xff] }
 0x209   :  { %v1736_v28 = vrot.slane %v1702_v9, 1  ;;  %v3203_v9 = vld [vmem:[%s4818_s2 + $0x238] sm:$0xff] }
 0x20a   :  { %2133 = vmatpush.bf16.msra.mxu0 %v3203_v9  ;;  %v2173_v9 = vld [vmem:[%s4819_s3 + $0x70] sm:$0xff] }
 0x20b   :  { %v1737_v54 = vsel %vm1734_vm1, %v1735_v19, %v1736_v28  ;;  %v1745_v61 = vsel %vm1734_vm1, %v1736_v28, 0.0  ;;  %v3210_v28 = vld [vmem:[%s4818_s2 + $0x270] sm:$0xff]  ;;  %v3209_v19 = vld [vmem:[%s4818_s2 + $0x268] sm:$0xff] }
 0x20c   :  { %v1747_v25 = vadd.f32 %v1737_v54, %v1726_v21  ;;  %v1748_v13 = vadd.f32 %v1745_v61, %v1727_v51  ;;  %2108 = vmatpush.bf16.msrb.mxu2 %v3186_v4  ;;  %2147 = vmatpush.bf16.msra.mxu1 %v3210_v28  ;;  %v2175_v4 = vld [vmem:[%s4819_s3 + $0x80] sm:$0xff]  ;;  %v2170_v28 = vld [vmem:[%s4819_s3 + $0x58] sm:$0xff] }
 0x20d   :  { %v1685_v12 = vpop.f32.mrf.mxu0 }
 0x20e   :  { %v1704_v5 = vpop.f32.mrf.mxu1  ;;  %v1753_v8 = vadd.f32 %v3234_v37, %v1747_v25  ;;  %v1754_v36 = vadd.f32 %v3234_v37, %v1748_v13  ;;  %2134 = vmatpush.bf16.msra.mxu0 %v3202_v57  ;;  %v2171_v57 = vld [vmem:[%s4819_s3 + $0x60] sm:$0xff] }
 0x20f   :  { %v1705_v49 = vadd.f32 %v1704_v5, %v1685_v12  ;;  %v3185_v12 = vld [vmem:[%s4818_s2 + $0x1a8] sm:$0xff] }
 0x210   :  { %v1757_v43 = vmax.f32 %v1753_v8, 0.0  ;;  %v1758_v53 = vmax.f32 %v1754_v36, 0.0  ;;  %v3201_v5 = vld [vmem:[%s4818_s2 + $0x228] sm:$0xff]  ;;  %2109 = vmatpush.bf16.msrb.mxu2 %v3185_v12  ;;  %2148 = vmatpush.bf16.msra.mxu1 %v3209_v19  ;;  %v2169_v12 = vld [vmem:[%s4819_s3 + $0x50] sm:$0xff] }
 0x211   :  { %v1738_v45 = vrot.slane %v1705_v49, 1 }
 0x212   :  { %v1763_v23 = vrot.slane %v1757_v43, 1  ;;  %v1781_v16 = vrot.slane %v1758_v53, 1  ;;  %2135 = vmatpush.bf16.msra.mxu0 %v3201_v5 }
 0x214   :  { %v1767_v29 = vmax.f32 %v1757_v43, %v1763_v23  ;;  %v4640_v0 = vmax.f32 %v1758_v53, %v1781_v16  ;;  %2110 = vmatpush.bf16.msrb.mxu2 %v3184_v15  ;;  %2149 = vmatpush.bf16.msra.mxu1 %v3208_v18  ;;  %v3198_v16 = vld [vmem:[%s4818_s2 + $0x210] sm:$0xff] }
 0x215   :  { %v1687_v63 = vpop.f32.mrf.mxu0 }
 0x216   :  { %v1706_v52 = vpop.f32.mrf.mxu1  ;;  %2136 = vmatpush.bf16.msra.mxu0 %v3200_v30 }
 0x217   :  { %v1707_v10 = vadd.f32 %v1706_v52, %v1687_v63  ;;  %v3190_v52 = vld [vmem:[%s4818_s2 + $0x1d0] sm:$0xff] }
 0x218   :  { %2111 = vmatpush.bf16.msrb.mxu2 %v3183_v41  ;;  %2150 = vmatpush.bf16.msra.mxu1 %v3207_v42  ;;  %v2167_v42 = vld [vmem:[%s4819_s3 + $0x40] sm:$0xff] }
 0x219   :  { %v1739_v22 = vrot.slane %v1707_v10, 1  ;;  %2125 = vmatpush.bf16.msrb.mxu3 %v3190_v52  ;;  %v2161_v52 = vld [vmem:[%s4819_s3 + $0x10] sm:$0xff] }
 0x21b   :  { %v1740_v34 = vsel %vm1734_vm1, %v1738_v45, %v1739_v22  ;;  %v1746_v38 = vsel %vm1734_vm1, %v1739_v22, 0.0 }
 0x21c   :  { %v1749_v20 = vadd.f32 %v1740_v34, %v1728_v59  ;;  %v1750_v55 = vadd.f32 %v1746_v38, %v1729_v46  ;;  %2112 = vmatpush.bf16.msrb.mxu2 %v3182_v39  ;;  %v3181_v34 = vld [vmem:[%s4818_s2 + $0x188] sm:$0xff]  ;;  %v2162_v39 = vld [vmem:[%s4819_s3 + $0x18] sm:$0xff] }
 0x21d   :  { %v3189_v38 = vld [vmem:[%s4818_s2 + $0x1c8] sm:$0xff] }
 0x21e   :  { %v1756_v6 = vadd.f32 %v3234_v37, %v1750_v55  ;;  %v1755_v1 = vadd.f32 %v3234_v37, %v1749_v20  ;;  %v3199_v37 = vld [vmem:[%s4818_s2 + $0x218] sm:$0xff]  ;;  %2126 = vmatpush.bf16.msrb.mxu3 %v3189_v38 }
 0x21f   :  { %2137 = vmatpush.bf16.msra.mxu0 %v3199_v37 }
 0x220   :  { %v1759_v44 = vmax.f32 %v1755_v1, 0.0  ;;  %v1760_v24 = vmax.f32 %v1756_v6, 0.0  ;;  %2113 = vmatpush.bf16.msrb.mxu2 %v3181_v34 }
 0x222   :  { %v1764_v3 = vrot.slane %v1759_v44, 1  ;;  %v1782_v11 = vrot.slane %v1760_v24, 1 }
 0x223   :  { %2138 = vmatpush.bf16.msra.mxu0 %v3198_v16 }
 0x224   :  { %v1768_v14 = vmax.f32 %v1759_v44, %v1764_v3  ;;  %v4638_v27 = vmax.f32 %v1760_v24, %v1782_v11  ;;  %v3188_v11 = vld [vmem:[%s4818_s2 + $0x1c0] sm:$0xff] }
 0x225   :  { %2127 = vmatpush.bf16.msrb.mxu3 %v3188_v11 }
 0x226   :  { %v3214_v26 = vpack.i.bf16 %v1768_v14, %v1767_v29  ;;  %v3219_v17 = vpack.i.bf16 %v4638_v27, %v4640_v0 }
 0x228   :  { %3215 = vrot.lane.b32.xlu0 %v3214_v26, %s3265_s11  ;;  %v3180_v26 = vld [vmem:[%s4818_s2 + $0x180] sm:$0xff] }
 0x229   :  { %2114 = vmatpush.bf16.msrb.mxu2 %v3180_v26 }
 0x22d   :  { %2178 = vmatpush.msra.mxu2 %v2175_v4 }
 0x22f   :  { %2179 = vmatpush.msra.mxu2 %v2174_v62 }
 0x230   :  { %3220 = vrot.lane.b32.xlu0 %v3219_v17, %s3265_s11  ;;  %v3205_v17 = vld [vmem:[%s4818_s2 + $0x248] sm:$0xff] }
 0x231   :  { %2180 = vmatpush.msra.mxu2 %v2173_v9 }
 0x233   :  { %2181 = vmatpush.msra.mxu2 %v2172_v47 }
 0x235   :  { %2182 = vmatpush.msra.mxu2 %v2171_v57 }
 0x237   :  { %2183 = vmatpush.msra.mxu2 %v2170_v28 }
 0x239   :  { %2184 = vmatpush.msra.mxu2 %v2169_v12 }
 0x23b   :  { %2185 = vmatpush.msra.mxu2 %v2168_v60 }
 0x23d   :  { %2186 = vmatpush.msra.mxu2 %v2167_v42 }
 0x29a   :  { %v3216_v54 = vpop.permute.xlu0 %3215 }
 0x29b   :  { %v3218_v21 = vunpack.i.h.bf16 %v3216_v54  ;;  %v3217_v32 = vunpack.i.l.bf16 %v3216_v54 }
 0x29d   :  { %v1778_v58 = vmax.f32 %v1768_v14, %v3218_v21  ;;  %v1777_v25 = vmax.f32 %v1767_v29, %v3217_v32 }
 0x29f   :  { %v1799_v49 = vrot.slane %v1778_v58, 7  ;;  %v1810_v63 = vrot.slane %v1778_v58, 3  ;;  %v1809_v2 = vrot.slane %v1777_v25, 4  ;;  %v1803_v50 = vrot.slane %v1777_v25, 2 }
 0x2a0   :  { %v1804_v10 = vrot.slane %v1778_v58, 1  ;;  %v1813_v40 = vrot.slane %v1777_v25, 6  ;;  %v1814_v56 = vrot.slane %v1778_v58, 5 }
 0x2a1   :  { %v4712_v8 = vsel %vm1800_vm2, %v1810_v63, %v1809_v2  ;;  %v4715_v31 = vsel %vm1800_vm2, %v1799_v49, %v1777_v25  ;;  %v2166_v49 = vld [vmem:[%s4819_s3 + $0x38] sm:$0xff]  ;;  %v2165_v63 = vld [vmem:[%s4819_s3 + $0x30] sm:$0xff]  ;;  %v2164_v2 = vld [vmem:[%s4819_s3 + $0x28] sm:$0xff] }
 0x2a2   :  { %v3221_v61 = vpop.permute.xlu0 %3220  ;;  %v1805_v45 = vsel %vm1800_vm2, %v1804_v10, %v1803_v50  ;;  %v1815_v22 = vsel %vm1800_vm2, %v1814_v56, %v1813_v40  ;;  %2187 = vmatpush.msra.mxu2 %v2166_v49  ;;  %v2163_v50 = vld [vmem:[%s4819_s3 + $0x20] sm:$0xff]  ;;  %v2160_v10 = vld [vmem:[%s4819_s3 + $0x8] sm:$0xff] }
 0x2a3   :  { %v3223_v51 = vunpack.i.h.bf16 %v3221_v61  ;;  %v3222_v59 = vunpack.i.l.bf16 %v3221_v61  ;;  %v3224_v46 = vpack.i.bf16 %v1815_v22, %v1805_v45  ;;  %v3235_v40 = vld [vmem:[%s4819_s3 + $0x1] ss:$0 sm:$0xff] }
 0x2a4   :  { %2188 = vmatpush.msra.mxu2 %v2165_v63 }
 0x2a5   :  { %v1796_v13 = vmax.f32 %v4638_v27, %v3223_v51  ;;  %v1795_v20 = vmax.f32 %v4640_v0, %v3222_v59  ;;  %3225 = vrot.lane.b32.xlu1 %v3224_v46, %s3265_s11  ;;  %v3206_v27 = vld [vmem:[%s4818_s2 + $0x250] sm:$0xff]  ;;  %v3197_v0 = vld [vmem:[%s4818_s2 + $0x208] sm:$0xff]  ;;  %s2205_s2 = sshll.u32 %s3266_s26, 4  ;;  %s2206_s2 = int_to_ptr.vmem [resolvable:$true] %s2205_s2 }
 0x2a6   :  { %2151 = vmatpush.bf16.msra.mxu1 %v3206_v27  ;;  %2139 = vmatpush.bf16.msra.mxu0 %v3197_v0 }
 0x2a7   :  { %v1821_v55 = vrot.slane %v1796_v13, 7  ;;  %v1831_v43 = vrot.slane %v1796_v13, 3  ;;  %v1830_v6 = vrot.slane %v1795_v20, 4  ;;  %v1824_v1 = vrot.slane %v1795_v20, 2  ;;  %2189 = vmatpush.msra.mxu2 %v2164_v2 }
 0x2a8   :  { %v1825_v36 = vrot.slane %v1796_v13, 1  ;;  %v1834_v44 = vrot.slane %v1795_v20, 6  ;;  %v1835_v23 = vrot.slane %v1796_v13, 5 }
 0x2a9   :  { %v1832_v24 = vsel %vm1800_vm2, %v1831_v43, %v1830_v6  ;;  %v1822_v3 = vsel %vm1800_vm2, %v1821_v55, %v1795_v20  ;;  %2190 = vmatpush.msra.mxu2 %v2163_v50  ;;  %v3236_v55 = vld [vmem:[%s4819_s3 + $0x2] ss:$0 sm:$0xff] }
 0x2aa   :  { %v1826_v53 = vsel %vm1800_vm2, %v1825_v36, %v1824_v1  ;;  %v1836_v29 = vsel %vm1800_vm2, %v1835_v23, %v1834_v44  ;;  %2152 = vmatpush.bf16.msra.mxu1 %v3205_v17  ;;  %2140 = vmatpush.bf16.msra.mxu0 %v3196_v33 }
 0x2ab   :  { %v3229_v14 = vpack.i.bf16 %v1836_v29, %v1826_v53  ;;  %2191 = vmatpush.msra.mxu2 %v2162_v39 }
 0x2ad   :  { %3230 = vrot.lane.b32.xlu1 %v3229_v14, %s3265_s11  ;;  %2192 = vmatpush.msra.mxu2 %v2161_v52 }
 0x2ae   :  { %2153 = vmatpush.bf16.msra.mxu1 %v3204_v7 }
 0x2af   :  { %2193 = vmatpush.msra.mxu2 %v2160_v10 }
 0x317   :  { %v3226_v5 = vpop.permute.xlu1 %3225 }
 0x318   :  { %v3228_v19 = vunpack.i.h.bf16 %v3226_v5  ;;  %v3227_v15 = vunpack.i.l.bf16 %v3226_v5 }
 0x31a   :  { %v1842_v35 = vsel %vm1840_vm3, %v4712_v8, %v3228_v19  ;;  %v1841_v30 = vsel %vm1840_vm3, %v4715_v31, %v3227_v15 }
 0x31b   :  { %v1846_v18 = vpack.c.bf16 %v1842_v35, %v1842_v35  ;;  %v1845_v54 = vpack.c.bf16 %v1841_v30, %v1841_v30 }
 0x31d   :  { %2115 = vmatmul.bf16.vlgmr.msrb.gmra.mxu2 %v1845_v54  ;;  %2128 = vmatmul.bf16.vlgmr.msrb.gmra.mxu3 %v1846_v18 }
 0x31f   :  { %v3231_v21 = vpop.permute.xlu1 %3230 }
 0x320   :  { %v3233_v32 = vunpack.i.h.bf16 %v3231_v21  ;;  %v3232_v41 = vunpack.i.l.bf16 %v3231_v21 }
 0x322   :  { %v1844_v48 = vsel %vm1840_vm3, %v1832_v24, %v3233_v32  ;;  %v1843_v58 = vsel %vm1840_vm3, %v1822_v3, %v3232_v41 }
 0x323   :  { %v1848_v25 = vpack.c.bf16 %v1844_v48, %v1844_v48  ;;  %v1847_v37 = vpack.c.bf16 %v1843_v58, %v1843_v58 }
 0x325   :  { %2141 = vmatmul.bf16.vlgmr.msra.gmra.mxu0 %v1847_v37  ;;  %2154 = vmatmul.bf16.vlgmr.msra.gmra.mxu1 %v1848_v25 }
 0x3a0   :  { %v2116_v56 = vpop.f32.mrf.mxu2  ;;  %v2129_v8 = vpop.f32.mrf.mxu3 }
 0x3a1   :  { %v2117_v31 = vadd.f32 %v3235_v40, %v2116_v56 }
 0x3a2   :  { %v2142_v61 = vpop.f32.mrf.mxu0  ;;  %v2155_v45 = vpop.f32.mrf.mxu1 }
 0x3a3   :  { %v2130_v22 = vadd.f32 %v2129_v8, %v2117_v31 }
 0x3a5   :  { %v2143_v51 = vadd.f32 %v2142_v61, %v2130_v22 }
 0x3a7   :  { %v2156_v59 = vadd.f32 %v2155_v45, %v2143_v51 }
 0x3a8   :  { %v2118_v46 = vpop.f32.mrf.mxu2  ;;  %v2131_v34 = vpop.f32.mrf.mxu3 }
 0x3a9   :  { %3237 = vtanh.f32 %v2156_v59 }
 0x3aa   :  { %v2144_v38 = vpop.f32.mrf.mxu0  ;;  %v2157_v13 = vpop.f32.mrf.mxu1 }
 0x3af   :  { %v3238_v20 = vpop.eup %3237 }
 0x3b0   :  { %2194 = vmatmul.f32.vlgmr.msra.gmra.mxu2 %v3238_v20 }
 0x433   :  { %v2195_v43 = vpop.f32.mrf.mxu2 }
 0x434   :  { %v2196_v6 = vadd.f32 %v3236_v55, %v2195_v43 }
 0x436   :  { %2199 = vst.msk [vmem:[#allocation2] sm:$0x3] %vm2198_vm4, %v2196_v6 }
 0x437   :  { %2210 = dma.vmem_to_hbm [thread:$0]  %s2206_s2, 32, %s2208_s29, [#allocation3]  }
 0x438   :  { %3263 = dma.done.wait [#allocation3], 32  }
 0x439   :  { %3264 = vsyncadd [#allocation3], 4294967264 }
 0x43a   :  { %2215 = vsyncpa [#allocation3], 1 }

</bundles_post_ra>
